<compile_context>
chip_gen: v7x
topology: tpu7x:2x2x1
jax: 0.10.0
libtpu: 0.0.40
codegen_flags: <defaults>
</compile_context>

<pallas_src>
import functools

import jax
import jax.numpy as jnp
from jax.experimental import pallas as pl
from jax.experimental.pallas import tpu as pltpu


def _ssim_kernel(dr_ref, x_ref, y_ref, sw_ref, sh_ref, o_ref, *,
                 win_size, k1, k2, tb, H, W):
    """SSIM for TB batch elements in one grid step.

    dr_ref : SMEM (N,) scalar-prefetch data ranges
    x_ref  : VMEM (TB, 1, H, W) float32
    y_ref  : VMEM (TB, 1, H, W) float32
    sw_ref : VMEM (W, Wo)  banded row-window matrix (scaled by 1/win^2)
    sh_ref : VMEM (5*TB*Ho, 5*TB*H)  block-diagonal column-window matrix
    o_ref  : VMEM (1, 1, TB) per-batch SSIM means
    """
    n = pl.program_id(0)
    Ho = H - win_size + 1
    Wo = W - win_size + 1
    np_ = float(win_size * win_size)
    cov_norm = np_ / (np_ - 1.0)

    xs = [x_ref[b, 0] for b in range(tb)]   # each (H, W)
    ys = [y_ref[b, 0] for b in range(tb)]

    # Stack the 5 filter inputs for all TB batch elements along sublanes:
    #   [x_0..x_{tb-1}, y_0.., xx_0.., yy_0.., xy_0..]  -> (5*tb*H, W)
    parts = (xs + ys
             + [xb * xb for xb in xs]
             + [yb * yb for yb in ys]
             + [xb * yb for xb, yb in zip(xs, ys)])
    slab = jnp.concatenate(parts, axis=0)

    # 7x7 box filter == two banded matmuls on the MXU (full f32 precision).
    r = jnp.dot(slab, sw_ref[...],
                precision=jax.lax.Precision.HIGHEST,
                preferred_element_type=jnp.float32)           # (5*tb*H, Wo)
    u = jnp.dot(sh_ref[...], r,
                precision=jax.lax.Precision.HIGHEST,
                preferred_element_type=jnp.float32)           # (5*tb*Ho, Wo)

    M = tb * Ho
    ux = u[0 * M:1 * M]
    uy = u[1 * M:2 * M]
    uxx = u[2 * M:3 * M]
    uyy = u[3 * M:4 * M]
    uxy = u[4 * M:5 * M]

    # Per-batch C1 / C2 as (M, 1) columns, broadcast along lanes.
    c1_col = jnp.concatenate(
        [jnp.full((Ho, 1), (k1 * dr_ref[n * tb + b]) ** 2, jnp.float32)
         for b in range(tb)], axis=0)
    c2_col = jnp.concatenate(
        [jnp.full((Ho, 1), (k2 * dr_ref[n * tb + b]) ** 2, jnp.float32)
         for b in range(tb)], axis=0)

    vx = cov_norm * (uxx - ux * ux)
    vy = cov_norm * (uyy - uy * uy)
    vxy = cov_norm * (uxy - ux * uy)

    a1 = 2.0 * ux * uy + c1_col
    a2 = 2.0 * vxy + c2_col
    b1 = ux * ux + uy * uy + c1_col
    b2 = vx + vy + c2_col
    s = (a1 * a2) / (b1 * b2)                                 # (M, Wo)

    inv = 1.0 / float(Ho * Wo)
    rowsum = jnp.sum(s, axis=1, keepdims=True)                # (M, 1)
    means = [jnp.sum(rowsum[b * Ho:(b + 1) * Ho], axis=0, keepdims=True) * inv
             for b in range(tb)]                              # each (1, 1)
    o_ref[...] = jnp.concatenate(means, axis=1).reshape(1, 1, tb)


def _pick_tb(n, h, w, budget_bytes=8 << 20):
    """Largest divisor of n (<=16) whose per-step working set stays modest."""
    tb = 1
    for t in range(1, min(n, 16) + 1):
        if n % t == 0 and t * h * w * 4 * 16 <= budget_bytes:
            tb = t
    return tb


def ssim_loss(X, Y, data_range, *, win_size=7, k1=0.01, k2=0.03):
    """Pallas equivalent of SSIMLoss.forward. X, Y: (N, 1, H, W); data_range: (N,)."""
    N, C, H, W = X.shape
    assert C == 1, "conv weight (1,1,w,w) implies single-channel input"
    assert H >= win_size and W >= win_size, "image smaller than SSIM window"

    if X.dtype != jnp.float32:
        X = X.astype(jnp.float32)
    if Y.dtype != jnp.float32:
        Y = Y.astype(jnp.float32)
    dr = data_range.astype(jnp.float32)

    Ho = H - win_size + 1
    Wo = W - win_size + 1
    tb = _pick_tb(N, H, W)
    grid = N // tb
    nb = 5 * tb

    # Banded 0/1 window matrices (host-side constants).
    jw = jnp.arange(W)[:, None]
    jo = jnp.arange(Wo)[None, :]
    sw = ((jw >= jo) & (jw < jo + win_size)).astype(jnp.float32) / float(win_size ** 2)
    io = jnp.arange(Ho)[:, None]
    ih = jnp.arange(H)[None, :]
    sh = ((ih >= io) & (ih < io + win_size)).astype(jnp.float32)          # (Ho, H)
    sh_big = jnp.kron(jnp.eye(nb, dtype=jnp.float32), sh)                 # (nb*Ho, nb*H)

    kernel = functools.partial(_ssim_kernel, win_size=win_size, k1=k1, k2=k2,
                               tb=tb, H=H, W=W)

    out = pl.pallas_call(
        kernel,
        out_shape=jax.ShapeDtypeStruct((grid, 1, tb), jnp.float32),
        grid_spec=pltpu.PrefetchScalarGridSpec(
            num_scalar_prefetch=1,  # data_range lands in SMEM
            grid=(grid,),
            in_specs=[
                pl.BlockSpec((tb, 1, H, W), lambda n, dr_ref: (n, 0, 0, 0)),
                pl.BlockSpec((tb, 1, H, W), lambda n, dr_ref: (n, 0, 0, 0)),
                pl.BlockSpec((W, Wo), lambda n, dr_ref: (0, 0)),
                pl.BlockSpec((nb * Ho, nb * H), lambda n, dr_ref: (0, 0)),
            ],
            out_specs=pl.BlockSpec((1, 1, tb), lambda n, dr_ref: (n, 0, 0)),
        ),
        compiler_params=pltpu.CompilerParams(
            dimension_semantics=("parallel",),
            vmem_limit_bytes=32 * 1024 * 1024,
        ),
    )(dr, X, Y, sw, sh_big)
    return out.reshape(N)


def _ref_ssim(X, Y, data_range, *, win_size=7, k1=0.01, k2=0.03):
    """Pure-JAX reference matching the PyTorch forward."""
    w = jnp.ones((1, 1, win_size, win_size), jnp.float32) / float(win_size ** 2)
    conv = lambda a: jax.lax.conv_general_dilated(
        a, w, (1, 1), "VALID", dimension_numbers=("NCHW", "OIHW", "NCHW"))
    dr = data_range[:, None, None, None]
    c1 = (k1 * dr) ** 2
    c2 = (k2 * dr) ** 2
    np_ = win_size ** 2
    cov_norm = np_ / (np_ - 1.0)
    ux, uy = conv(X), conv(Y)
    uxx, uyy, uxy = conv(X * X), conv(Y * Y), conv(X * Y)
    vx = cov_norm * (uxx - ux * ux)
    vy = cov_norm * (uyy - uy * uy)
    vxy = cov_norm * (uxy - ux * uy)
    a1, a2 = 2 * ux * uy + c1, 2 * vxy + c2
    b1, b2 = ux ** 2 + uy ** 2 + c1, vx + vy + c2
    s = a1 * a2 / (b1 * b2)
    return s.mean(axis=(1, 2, 3))


if __name__ == "__main__":
    key = jax.random.PRNGKey(0)
    kx, ky = jax.random.split(key)
    N, C, H, W = 2, 1, 16, 16
    X = jax.random.uniform(kx, (N, C, H, W), dtype=jnp.float32)
    Y = jax.random.uniform(ky, (N, C, H, W), dtype=jnp.float32)
    data_range = jnp.maximum(
        X.reshape(N, -1).max(axis=1), Y.reshape(N, -1).max(axis=1))  # (N,)

    out = ssim_loss(X, Y, data_range)
    jax.block_until_ready(out)

    ref = _ref_ssim(X, Y, data_range)
    assert jnp.allclose(out, ref, rtol=1e-3, atol=1e-5), (out, ref)

    print("KERNEL_OK")
</pallas_src>

<mosaic_0001>
module attributes {stable_mosaic.version = 11 : i64} {
  func.func @_ssim_kernel(%arg0: i32, %arg1: memref<2xf32, #tpu.memory_space<smem>>, %arg2: memref<2x1x16x16xf32, #tpu.memory_space<vmem>>, %arg3: memref<2x1x16x16xf32, #tpu.memory_space<vmem>>, %arg4: memref<16x10xf32, #tpu.memory_space<vmem>>, %arg5: memref<100x160xf32, #tpu.memory_space<vmem>>, %arg6: memref<1x1x2xf32, #tpu.memory_space<vmem>>) attributes {dimension_semantics = [#tpu.dimension_semantics<parallel>], iteration_bounds = array<i64: 1>, scalar_prefetch = 1 : i64, scratch_operands = 0 : i64, tpu.core_type = #tpu.core_type<tc>, window_params = [{transform_indices = @transform_0, window_bounds = array<i64: 2, 1, 16, 16>}, {transform_indices = @transform_1, window_bounds = array<i64: 2, 1, 16, 16>}, {pipeline_mode = #tpu.pipeline_mode<synchronous>, transform_indices = @transform_2, window_bounds = array<i64: 16, 10>}, {pipeline_mode = #tpu.pipeline_mode<synchronous>, transform_indices = @transform_3, window_bounds = array<i64: 100, 160>}, {transform_indices = @transform_4, window_bounds = array<i64: 1, 1, 2>}]} {
    %c0 = arith.constant 0 : index
    %c0_0 = arith.constant 0 : index
    %c0_1 = arith.constant 0 : index
    %c0_2 = arith.constant 0 : index
    %0 = vector.load %arg2[%c0, %c0_0, %c0_1, %c0_2] : memref<2x1x16x16xf32, #tpu.memory_space<vmem>>, vector<1x1x16x16xf32>
    %1 = vector.shape_cast %0 : vector<1x1x16x16xf32> to vector<16x16xf32>
    %c1 = arith.constant 1 : index
    %c0_3 = arith.constant 0 : index
    %c0_4 = arith.constant 0 : index
    %c0_5 = arith.constant 0 : index
    %2 = vector.load %arg2[%c1, %c0_3, %c0_4, %c0_5] : memref<2x1x16x16xf32, #tpu.memory_space<vmem>>, vector<1x1x16x16xf32>
    %3 = vector.shape_cast %2 : vector<1x1x16x16xf32> to vector<16x16xf32>
    %c0_6 = arith.constant 0 : index
    %c0_7 = arith.constant 0 : index
    %c0_8 = arith.constant 0 : index
    %c0_9 = arith.constant 0 : index
    %4 = vector.load %arg3[%c0_6, %c0_7, %c0_8, %c0_9] : memref<2x1x16x16xf32, #tpu.memory_space<vmem>>, vector<1x1x16x16xf32>
    %5 = vector.shape_cast %4 : vector<1x1x16x16xf32> to vector<16x16xf32>
    %c1_10 = arith.constant 1 : index
    %c0_11 = arith.constant 0 : index
    %c0_12 = arith.constant 0 : index
    %c0_13 = arith.constant 0 : index
    %6 = vector.load %arg3[%c1_10, %c0_11, %c0_12, %c0_13] : memref<2x1x16x16xf32, #tpu.memory_space<vmem>>, vector<1x1x16x16xf32>
    %7 = vector.shape_cast %6 : vector<1x1x16x16xf32> to vector<16x16xf32>
    %8 = arith.mulf %1, %1 : vector<16x16xf32>
    %9 = arith.mulf %3, %3 : vector<16x16xf32>
    %10 = arith.mulf %5, %5 : vector<16x16xf32>
    %11 = arith.mulf %7, %7 : vector<16x16xf32>
    %12 = arith.mulf %1, %5 : vector<16x16xf32>
    %13 = arith.mulf %3, %7 : vector<16x16xf32>
    %14 = tpu.concatenate %1, %3, %5, %7, %8, %9, %10, %11, %12, %13 in 0 : vector<16x16xf32>, vector<16x16xf32>, vector<16x16xf32>, vector<16x16xf32>, vector<16x16xf32>, vector<16x16xf32>, vector<16x16xf32>, vector<16x16xf32>, vector<16x16xf32>, vector<16x16xf32> -> vector<160x16xf32>
    %c0_14 = arith.constant 0 : index
    %c0_15 = arith.constant 0 : index
    %15 = vector.load %arg4[%c0_14, %c0_15] : memref<16x10xf32, #tpu.memory_space<vmem>>, vector<16x10xf32>
    %cst = arith.constant dense<0.000000e+00> : vector<160x10xf32>
    %16 = tpu.matmul %14, %15, %cst {dimension_numbers = #tpu.dot_dimension_numbers<[1], [0], [0], [1], [0, 0, 1, 1], [], []>, precision = #tpu.contract_precision<fp32>} : vector<160x16xf32>, vector<16x10xf32>, vector<160x10xf32> -> vector<160x10xf32>
    %c0_16 = arith.constant 0 : index
    %c0_17 = arith.constant 0 : index
    %17 = vector.load %arg5[%c0_16, %c0_17] : memref<100x160xf32, #tpu.memory_space<vmem>>, vector<100x160xf32>
    %cst_18 = arith.constant dense<0.000000e+00> : vector<100x10xf32>
    %18 = tpu.matmul %17, %16, %cst_18 {dimension_numbers = #tpu.dot_dimension_numbers<[1], [0], [0], [1], [0, 0, 1, 1], [], []>, precision = #tpu.contract_precision<fp32>} : vector<100x160xf32>, vector<160x10xf32>, vector<100x10xf32> -> vector<100x10xf32>
    %19 = vector.extract_strided_slice %18 {offsets = [0, 0], sizes = [20, 10], strides = [1, 1]} : vector<100x10xf32> to vector<20x10xf32>
    %20 = vector.extract_strided_slice %18 {offsets = [20, 0], sizes = [20, 10], strides = [1, 1]} : vector<100x10xf32> to vector<20x10xf32>
    %21 = vector.extract_strided_slice %18 {offsets = [40, 0], sizes = [20, 10], strides = [1, 1]} : vector<100x10xf32> to vector<20x10xf32>
    %22 = vector.extract_strided_slice %18 {offsets = [60, 0], sizes = [20, 10], strides = [1, 1]} : vector<100x10xf32> to vector<20x10xf32>
    %23 = vector.extract_strided_slice %18 {offsets = [80, 0], sizes = [20, 10], strides = [1, 1]} : vector<100x10xf32> to vector<20x10xf32>
    %c2_i32 = arith.constant 2 : i32
    %24 = arith.muli %arg0, %c2_i32 : i32
    %c0_i32 = arith.constant 0 : i32
    %25 = arith.addi %24, %c0_i32 : i32
    %26 = arith.index_cast %25 : i32 to index
    %27 = memref.load %arg1[%26] : memref<2xf32, #tpu.memory_space<smem>>
    %cst_19 = arith.constant 0.00999999977 : f32
    %28 = arith.mulf %cst_19, %27 : f32
    %29 = arith.mulf %28, %28 : f32
    %30 = vector.broadcast %29 : f32 to vector<10x1xf32>
    %c2_i32_20 = arith.constant 2 : i32
    %31 = arith.muli %arg0, %c2_i32_20 : i32
    %c1_i32 = arith.constant 1 : i32
    %32 = arith.addi %31, %c1_i32 : i32
    %33 = arith.index_cast %32 : i32 to index
    %34 = memref.load %arg1[%33] : memref<2xf32, #tpu.memory_space<smem>>
    %cst_21 = arith.constant 0.00999999977 : f32
    %35 = arith.mulf %cst_21, %34 : f32
    %36 = arith.mulf %35, %35 : f32
    %37 = vector.broadcast %36 : f32 to vector<10x1xf32>
    %38 = tpu.concatenate %30, %37 in 0 : vector<10x1xf32>, vector<10x1xf32> -> vector<20x1xf32>
    %c2_i32_22 = arith.constant 2 : i32
    %39 = arith.muli %arg0, %c2_i32_22 : i32
    %c0_i32_23 = arith.constant 0 : i32
    %40 = arith.addi %39, %c0_i32_23 : i32
    %41 = arith.index_cast %40 : i32 to index
    %42 = memref.load %arg1[%41] : memref<2xf32, #tpu.memory_space<smem>>
    %cst_24 = arith.constant 3.000000e-02 : f32
    %43 = arith.mulf %cst_24, %42 : f32
    %44 = arith.mulf %43, %43 : f32
    %45 = vector.broadcast %44 : f32 to vector<10x1xf32>
    %c2_i32_25 = arith.constant 2 : i32
    %46 = arith.muli %arg0, %c2_i32_25 : i32
    %c1_i32_26 = arith.constant 1 : i32
    %47 = arith.addi %46, %c1_i32_26 : i32
    %48 = arith.index_cast %47 : i32 to index
    %49 = memref.load %arg1[%48] : memref<2xf32, #tpu.memory_space<smem>>
    %cst_27 = arith.constant 3.000000e-02 : f32
    %50 = arith.mulf %cst_27, %49 : f32
    %51 = arith.mulf %50, %50 : f32
    %52 = vector.broadcast %51 : f32 to vector<10x1xf32>
    %53 = tpu.concatenate %45, %52 in 0 : vector<10x1xf32>, vector<10x1xf32> -> vector<20x1xf32>
    %54 = arith.mulf %19, %19 : vector<20x10xf32>
    %55 = arith.subf %21, %54 : vector<20x10xf32>
    %cst_28 = arith.constant 1.02083337 : f32
    %56 = vector.broadcast %cst_28 : f32 to vector<20x10xf32>
    %57 = arith.mulf %56, %55 : vector<20x10xf32>
    %58 = arith.mulf %20, %20 : vector<20x10xf32>
    %59 = arith.subf %22, %58 : vector<20x10xf32>
    %cst_29 = arith.constant 1.02083337 : f32
    %60 = vector.broadcast %cst_29 : f32 to vector<20x10xf32>
    %61 = arith.mulf %60, %59 : vector<20x10xf32>
    %62 = arith.mulf %19, %20 : vector<20x10xf32>
    %63 = arith.subf %23, %62 : vector<20x10xf32>
    %cst_30 = arith.constant 1.02083337 : f32
    %64 = vector.broadcast %cst_30 : f32 to vector<20x10xf32>
    %65 = arith.mulf %64, %63 : vector<20x10xf32>
    %cst_31 = arith.constant 2.000000e+00 : f32
    %66 = vector.broadcast %cst_31 : f32 to vector<20x10xf32>
    %67 = arith.mulf %66, %19 : vector<20x10xf32>
    %68 = arith.mulf %67, %20 : vector<20x10xf32>
    %69 = vector.broadcast %38 : vector<20x1xf32> to vector<20x10xf32>
    %70 = arith.addf %68, %69 : vector<20x10xf32>
    %cst_32 = arith.constant 2.000000e+00 : f32
    %71 = vector.broadcast %cst_32 : f32 to vector<20x10xf32>
    %72 = arith.mulf %71, %65 : vector<20x10xf32>
    %73 = vector.broadcast %53 : vector<20x1xf32> to vector<20x10xf32>
    %74 = arith.addf %72, %73 : vector<20x10xf32>
    %75 = arith.mulf %19, %19 : vector<20x10xf32>
    %76 = arith.mulf %20, %20 : vector<20x10xf32>
    %77 = arith.addf %75, %76 : vector<20x10xf32>
    %78 = vector.broadcast %38 : vector<20x1xf32> to vector<20x10xf32>
    %79 = arith.addf %77, %78 : vector<20x10xf32>
    %80 = arith.addf %57, %61 : vector<20x10xf32>
    %81 = vector.broadcast %53 : vector<20x1xf32> to vector<20x10xf32>
    %82 = arith.addf %80, %81 : vector<20x10xf32>
    %83 = arith.mulf %70, %74 : vector<20x10xf32>
    %84 = arith.mulf %79, %82 : vector<20x10xf32>
    %85 = arith.divf %83, %84 : vector<20x10xf32>
    %cst_33 = arith.constant dense<0.000000e+00> : vector<20xf32>
    %86 = vector.multi_reduction <add>, %85, %cst_33 [1] : vector<20x10xf32> to vector<20xf32>
    %87 = vector.shape_cast %86 : vector<20xf32> to vector<20x1xf32>
    %88 = vector.extract_strided_slice %87 {offsets = [0, 0], sizes = [10, 1], strides = [1, 1]} : vector<20x1xf32> to vector<10x1xf32>
    %cst_34 = arith.constant dense<0.000000e+00> : vector<1xf32>
    %89 = vector.multi_reduction <add>, %88, %cst_34 [0] : vector<10x1xf32> to vector<1xf32>
    %90 = vector.shape_cast %89 : vector<1xf32> to vector<1x1xf32>
    %cst_35 = arith.constant 0.00999999977 : f32
    %91 = vector.broadcast %cst_35 : f32 to vector<1x1xf32>
    %92 = arith.mulf %90, %91 : vector<1x1xf32>
    %93 = vector.extract_strided_slice %87 {offsets = [10, 0], sizes = [10, 1], strides = [1, 1]} : vector<20x1xf32> to vector<10x1xf32>
    %cst_36 = arith.constant dense<0.000000e+00> : vector<1xf32>
    %94 = vector.multi_reduction <add>, %93, %cst_36 [0] : vector<10x1xf32> to vector<1xf32>
    %95 = vector.shape_cast %94 : vector<1xf32> to vector<1x1xf32>
    %cst_37 = arith.constant 0.00999999977 : f32
    %96 = vector.broadcast %cst_37 : f32 to vector<1x1xf32>
    %97 = arith.mulf %95, %96 : vector<1x1xf32>
    %98 = tpu.concatenate %92, %97 in 1 : vector<1x1xf32>, vector<1x1xf32> -> vector<1x2xf32>
    %99 = vector.shape_cast %98 : vector<1x2xf32> to vector<1x1x2xf32>
    %c0_38 = arith.constant 0 : index
    %c0_39 = arith.constant 0 : index
    %c0_40 = arith.constant 0 : index
    %100 = vector.load %arg6[%c0_38, %c0_39, %c0_40] : memref<1x1x2xf32, #tpu.memory_space<vmem>>, vector<1x1x2xf32>
    tpu.vector_store %arg6[%c0_38, %c0_39, %c0_40], %99 {strides = array<i32>} : memref<1x1x2xf32, #tpu.memory_space<vmem>>, vector<1x1x2xf32>,
    return
  }
  func.func @transform_0(%arg0: i32, %arg1: memref<2xf32, #tpu.memory_space<smem>>) -> (i32, i32, i32, i32) {
    %c0_i32 = arith.constant 0 : i32
    %c0_i32_0 = arith.constant 0 : i32
    %c0_i32_1 = arith.constant 0 : i32
    %c0_i32_2 = arith.constant 0 : i32
    return %arg0, %c0_i32, %c0_i32_0, %c0_i32_1 : i32, i32, i32, i32
  }
  func.func @transform_1(%arg0: i32, %arg1: memref<2xf32, #tpu.memory_space<smem>>) -> (i32, i32, i32, i32) {
    %c0_i32 = arith.constant 0 : i32
    %c0_i32_0 = arith.constant 0 : i32
    %c0_i32_1 = arith.constant 0 : i32
    %c0_i32_2 = arith.constant 0 : i32
    return %arg0, %c0_i32, %c0_i32_0, %c0_i32_1 : i32, i32, i32, i32
  }
  func.func @transform_2(%arg0: i32, %arg1: memref<2xf32, #tpu.memory_space<smem>>) -> (i32, i32) {
    %c0_i32 = arith.constant 0 : i32
    %c0_i32_0 = arith.constant 0 : i32
    %c0_i32_1 = arith.constant 0 : i32
    return %c0_i32, %c0_i32_0 : i32, i32
  }
  func.func @transform_3(%arg0: i32, %arg1: memref<2xf32, #tpu.memory_space<smem>>) -> (i32, i32) {
    %c0_i32 = arith.constant 0 : i32
    %c0_i32_0 = arith.constant 0 : i32
    %c0_i32_1 = arith.constant 0 : i32
    return %c0_i32, %c0_i32_0 : i32, i32
  }
  func.func @transform_4(%arg0: i32, %arg1: memref<2xf32, #tpu.memory_space<smem>>) -> (i32, i32, i32) {
    %c0_i32 = arith.constant 0 : i32
    %c0_i32_0 = arith.constant 0 : i32
    %c0_i32_1 = arith.constant 0 : i32
    return %arg0, %c0_i32, %c0_i32_0 : i32, i32, i32
  }
}

</mosaic_0001>

<bundles_post_ra>
// kernel: tpu_custom_call.1
= control target key start
LH: loop header
LB: loop body
LE: loop exit
PB: predicated region body
PF: predicated region fallthrough
CT: control target
= control target key end

     0   :  { %s5258_s0 = inlined_call_operand.vmem [shape: f32[2], index: 0, kind: input, shape index: {}]   ;;  %s5259_s1 = inlined_call_operand.vmem [shape: f32[2,1,16,16], index: 1, kind: input, shape index: {}]   ;;  %s5260_s2 = inlined_call_operand.vmem [shape: f32[2,1,16,16], index: 2, kind: input, shape index: {}]   ;;  %s5261_s3 = inlined_call_operand.vmem [shape: f32[16,10], index: 3, kind: input, shape index: {}]   ;;  %s5262_s4 = inlined_call_operand.vmem [shape: f32[100,160], index: 4, kind: input, shape index: {}]   ;;  %s5263_s5 = inlined_call_operand.hbm [shape: f32[1,1,2], index: 5, kind: output, shape index: {}]  }
   0x1   :  { %s10_s20 = sshll.u32 %s5258_s0, 4  ;;  %s11_s20 = int_to_ptr.vmem [resolvable:$true] %s10_s20 }
   0x2   :  { %s3805_s21 = scalar_lea.vmem %s11_s20, 16  ;;  %p3810_p1 = scmp.lt.s32.totalorder %s11_s20, %s11_s20 }
   0x3   :  { %p3806_p0 = scmp.ne.s32.totalorder %s11_s20, %s3805_s21  ;;  %p3811_p2 = scmp.lt.s32.totalorder %s3805_s21, %s3805_s21 }
   0x5   :  { %p3812_p3 = por %p3811_p2, %p3810_p1 }
   0x7   :  { %p3813_p4 = pnand %p3812_p3, %p3806_p0 }
   0x9   :  { %3816 = shalt.err (!%p3813_p4)  }
   0xa   :  { %s3843_s22 = smov [#allocation3]  }
   0xb   :  { %13 = dma.vmem_to_smem %s11_s20, 16, %s3843_s22, [#allocation2] }
   0xc   :  { %3839 = dma.done.wait [#allocation2], 16 }
   0xd   :  { %3840 = vsyncadd [#allocation2], 4294967280 }
   0xe   :  { %15 = sfence }
   0xf   :  { %v47_v0 = vld [vmem:[%s5261_s3] sm:$0xff]  ;;  %v48_v1 = vld [vmem:[%s5261_s3 + $0x8] sm:$0xff]  ;;  %vm49_vm0 = vcmask 130048   ;;  %v3903_v9 = vld [vmem:[%s5259_s1 + $0x10] sm:$0xff] }
  0x10   :  { %v25_v2 = vld [vmem:[%s5259_s1] sm:$0xff]  ;;  %v111_v3 = vand.u32 4294901760, %v47_v0  ;;  %v114_v4 = vand.u32 4294901760, %v48_v1  ;;  %v3898_v8 = vld [vmem:[%s5259_s1 + $0x8] sm:$0xff]  ;;  %v57_v13 = vsel %vm49_vm0, %v3903_v9, 0  ;;  %v3917_v14 = vld [vmem:[%s5259_s1 + $0x18] sm:$0xff] }
  0x11   :  { %v3892_v5 = vld [vmem:[%s5260_s2] sm:$0xff]  ;;  %v35_v6 = vmul.f32 %v25_v2, %v25_v2  ;;  %v51_v7 = vsel %vm49_vm0, %v25_v2, 0  ;;  %v54_v12 = vsel %vm49_vm0, %v3898_v8, 0  ;;  %v3930_v19 = vld [vmem:[%s5260_s2 + $0x8] sm:$0xff] }
  0x12   :  { %v3906_v10 = vmul.f32 %v3892_v5, %v25_v2  ;;  %v3908_v11 = vand.u32 4294901760, %v51_v7  ;;  %v3919_v15 = vpack.c.bf16 %v114_v4, %v111_v3  ;;  %v3921_v16 = vand.u32 4294901760, %v54_v12 }
  0x13   :  { %v3923_v17 = vsub.f32 %v47_v0, %v111_v3  ;;  %v3925_v18 = vsub.f32 %v48_v1, %v114_v4 }
  0x14   :  { %16 = vsyncpa [#allocation5], 0  ;;  %v3933_v20 = vsub.f32 %v51_v7, %v3908_v11  ;;  %v3935_v21 = vand.u32 4294901760, %v57_v13  ;;  %v60_v22 = vsel %vm49_vm0, %v3917_v14, 0  ;;  %v63_v23 = vsel %vm49_vm0, %v3892_v5, 0  ;;  %3373 = vmatprep.subr.bf16.mxu0 %v3919_v15  ;;  %v3980_v40 = vld [vmem:[%s5260_s2 + $0x10] sm:$0xff] }
  0x15   :  { %v3943_v24 = vsub.f32 %v54_v12, %v3921_v16  ;;  %v380_v25 = vand.u32 4294901760, %v3923_v17  ;;  %v387_v26 = vand.u32 4294901760, %v3925_v18  ;;  %v3947_v27 = vand.u32 4294901760, %v60_v22  ;;  %3375 = vmatpush3.bf16.msra.mxu0 %v3919_v15  ;;  %v3996_v49 = vld [vmem:[%s5260_s2 + $0x18] sm:$0xff]  ;;  %s5087_s10 = sld [smem:[#allocation3]]  ;;  %s3846_s17 = smov [#allocation4]  }
  0x16   :  { %v179_v28 = vand.u32 4294901760, %v3933_v20  ;;  %v3952_v29 = vsub.f32 %v57_v13, %v3935_v21  ;;  %v3954_v30 = vand.u32 4294901760, %v63_v23  ;;  %v66_v31 = vsel %vm49_vm0, %v3930_v19, 0  ;;  %s3023_s18 = sshll.u32 %s3846_s17, 4  ;;  %s3024_s18 = int_to_ptr.vmem [resolvable:$true] %s3023_s18 }
  0x17   :  { %v189_v32 = vand.u32 4294901760, %v3943_v24  ;;  %v381_v33 = vsub.f32 %v3923_v17, %v380_v25  ;;  %v388_v34 = vsub.f32 %v3925_v18, %v387_v26  ;;  %v3966_v35 = vsub.f32 %v60_v22, %v3947_v27  ;;  %s3817_s19 = scalar_lea.vmem %s3024_s18, 16  ;;  %s3821_s20 = scalar_lea.vmem %s3024_s18, 32 }
  0x18   :  { %v180_v36 = vsub.f32 %v3933_v20, %v179_v28  ;;  %v199_v37 = vand.u32 4294901760, %v3952_v29  ;;  %v3973_v38 = vsub.f32 %v63_v23, %v3954_v30  ;;  %v3975_v39 = vand.u32 4294901760, %v66_v31  ;;  %p3818_p5 = scmp.ne.s32.totalorder %s3024_s18, %s3817_s19  ;;  %p3822_p6 = scmp.lt.s32.totalorder %s3024_s18, %s3024_s18 }
  0x19   :  { %v190_v41 = vsub.f32 %v3943_v24, %v189_v32  ;;  %v382_v42 = vand.u32 4294901760, %v381_v33  ;;  %v389_v43 = vand.u32 4294901760, %v388_v34  ;;  %v209_v44 = vand.u32 4294901760, %v3966_v35  ;;  %p3823_p7 = scmp.lt.s32.totalorder %s3821_s20, %s3817_s19 }
  0x1a   :  { %v181_v45 = vand.u32 4294901760, %v180_v36  ;;  %v200_v46 = vsub.f32 %v3952_v29, %v199_v37  ;;  %v219_v47 = vand.u32 4294901760, %v3973_v38  ;;  %v3991_v48 = vsub.f32 %v66_v31, %v3975_v39 }
  0x1b   :  { %v191_v50 = vand.u32 4294901760, %v190_v41  ;;  %v3376_v51 = vpack.c.bf16 %v389_v43, %v382_v42  ;;  %v210_v52 = vsub.f32 %v3966_v35, %v209_v44  ;;  %v69_v53 = vsel %vm49_vm0, %v3980_v40, 0  ;;  %s2832_s1 = smul.f32 0.01, %s5087_s10  ;;  %p3824_p8 = por %p3823_p7, %p3822_p6 }
  0x1c   :  { %3172 = vmatprep.mubr.f32.mxu0 %v181_v45  ;;  %v201_v54 = vand.u32 4294901760, %v200_v46  ;;  %v220_v55 = vsub.f32 %v3973_v38, %v219_v47  ;;  %v229_v56 = vand.u32 4294901760, %v3991_v48  ;;  %v4007_v57 = vand.u32 4294901760, %v69_v53  ;;  %s2842_s2 = smul.f32 0.03, %s5087_s10 }
  0x1d   :  { %3173 = vmatmul.mubr.f32.vlgmr.msra.gmra.mrb[0].mxu0 %v191_v50  ;;  %3377 = vmatprep.subr.bf16.mxu0 %v3376_v51  ;;  %v211_v58 = vand.u32 4294901760, %v210_v52  ;;  %v72_v59 = vsel %vm49_vm0, %v3996_v49, 0  ;;  %v75_v60 = vsel %vm49_vm0, %v35_v6, 0  ;;  %v36_v61 = vmul.f32 %v3898_v8, %v3898_v8  ;;  %s2833_s13 = smul.f32 %s2832_s1, %s2832_s1  ;;  %p3825_p9 = pnand %p3824_p8, %p3818_p5 }
  0x1e   :  { %3379 = vmatpush3.bf16.msra.mxu0 %v3376_v51  ;;  %3175 = vmatprep.mubr.f32.mxu0 %v201_v54  ;;  %v221_v62 = vand.u32 4294901760, %v220_v55  ;;  %v230_v63 = vsub.f32 %v3991_v48, %v229_v56  ;;  %v4018_v0 = vsub.f32 %v69_v53, %v4007_v57  ;;  %v4020_v1 = vand.u32 4294901760, %v72_v59  ;;  %s2843_s16 = smul.f32 %s2842_s2, %s2842_s2 }
  0x1f   :  { %v4022_v2 = vand.u32 4294901760, %v75_v60  ;;  %v78_v3 = vsel %vm49_vm0, %v36_v61, 0  ;;  %v37_v4 = vmul.f32 %v3903_v9, %v3903_v9  ;;  %v38_v6 = vmul.f32 %v3917_v14, %v3917_v14 }
  0x20   :  { %v231_v7 = vand.u32 4294901760, %v230_v63  ;;  %v239_v12 = vand.u32 4294901760, %v4018_v0  ;;  %v4031_v13 = vsub.f32 %v72_v59, %v4020_v1  ;;  %v4033_v22 = vand.u32 4294901760, %v78_v3 }
  0x21   :  { %3176 = vmatmul.mubr.f32.gmra.mrb[2].mxu0 %v211_v58  ;;  %v4036_v23 = vsub.f32 %v75_v60, %v4022_v2  ;;  %v81_v31 = vsel %vm49_vm0, %v37_v4, 0  ;;  %v84_v33 = vsel %vm49_vm0, %v38_v6, 0  ;;  %v39_v34 = vmul.f32 %v3892_v5, %v3892_v5 }
  0x22   :  { %3178 = vmatprep.mubr.f32.mxu0 %v221_v62  ;;  %v240_v36 = vsub.f32 %v4018_v0, %v239_v12  ;;  %v5268_v41 = vand.u32 4294901760, %v4031_v13  ;;  %v4047_v42 = vsub.f32 %v78_v3, %v4033_v22  ;;  %v4049_v43 = vand.u32 4294901760, %v81_v31 }
  0x23   :  { %v5267_v45 = vand.u32 4294901760, %v4036_v23  ;;  %v4052_v46 = vand.u32 4294901760, %v84_v33  ;;  %v87_v50 = vsel %vm49_vm0, %v39_v34, 0  ;;  %v40_v5 = vmul.f32 %v3930_v19, %v3930_v19 }
  0x24   :  { %v241_v51 = vand.u32 4294901760, %v240_v36  ;;  %v250_v52 = vsub.f32 %v4031_v13, %v5268_v41  ;;  %v5265_v53 = vand.u32 4294901760, %v4047_v42  ;;  %v4062_v54 = vsub.f32 %v81_v31, %v4049_v43 }
  0x25   :  { %3179 = vmatmul.mubr.f32.gmra.mrb[4].mxu0 %v231_v7  ;;  %v260_v55 = vsub.f32 %v4036_v23, %v5267_v45  ;;  %v4068_v58 = vsub.f32 %v84_v33, %v4052_v46  ;;  %v4070_v59 = vand.u32 4294901760, %v87_v50  ;;  %v90_v60 = vsel %vm49_vm0, %v40_v5, 0 }
  0x26   :  { %3181 = vmatprep.mubr.f32.mxu0 %v241_v51  ;;  %v251_v61 = vand.u32 4294901760, %v250_v52  ;;  %v270_v62 = vsub.f32 %v4047_v42, %v5265_v53  ;;  %v5264_v63 = vand.u32 4294901760, %v4062_v54  ;;  %v4077_v3 = vand.u32 4294901760, %v90_v60 }
  0x27   :  { %v261_v4 = vand.u32 4294901760, %v260_v55  ;;  %v5266_v6 = vand.u32 4294901760, %v4068_v58  ;;  %v4081_v7 = vsub.f32 %v87_v50, %v4070_v59  ;;  %v41_v31 = vmul.f32 %v3980_v40, %v3980_v40 }
  0x28   :  { %v271_v33 = vand.u32 4294901760, %v270_v62  ;;  %v280_v34 = vsub.f32 %v4062_v54, %v5264_v63  ;;  %v4089_v36 = vsub.f32 %v90_v60, %v4077_v3  ;;  %v42_v5 = vmul.f32 %v3996_v49, %v3996_v49 }
  0x29   :  { %3182 = vmatmul.mubr.f32.gmra.mrb[6].mxu0 %v251_v61  ;;  %v290_v50 = vsub.f32 %v4068_v58, %v5266_v6  ;;  %v5269_v51 = vand.u32 4294901760, %v4081_v7  ;;  %v93_v52 = vsel %vm49_vm0, %v41_v31, 0  ;;  %v99_v55 = vsel %vm49_vm0, %v3906_v10, 0 }
  0x2a   :  { %3184 = vmatprep.mubr.f32.mxu0 %v261_v4  ;;  %v281_v62 = vand.u32 4294901760, %v280_v34  ;;  %v5270_v60 = vand.u32 4294901760, %v4089_v36  ;;  %v4101_v63 = vand.u32 4294901760, %v93_v52  ;;  %v96_v53 = vsel %vm49_vm0, %v42_v5, 0 }
  0x2b   :  { %v300_v61 = vsub.f32 %v4081_v7, %v5269_v51  ;;  %v4107_v6 = vand.u32 4294901760, %v96_v53  ;;  %v4109_v45 = vand.u32 4294901760, %v99_v55  ;;  %v291_v31 = vand.u32 4294901760, %v290_v50 }
  0x2c   :  { %v4112_v41 = vsub.f32 %v93_v52, %v4101_v63  ;;  %v44_v10 = vmul.f32 %v3930_v19, %v3898_v8  ;;  %v45_v4 = vmul.f32 %v3980_v40, %v3903_v9  ;;  %v310_v34 = vsub.f32 %v4089_v36, %v5270_v60 }
  0x2d   :  { %3185 = vmatmul.mubr.f32.gmra.mrb[8].mxu0 %v271_v33  ;;  %v4122_v5 = vsub.f32 %v96_v53, %v4107_v6  ;;  %v4125_v51 = vsub.f32 %v99_v55, %v4109_v45  ;;  %v46_v50 = vmul.f32 %v3996_v49, %v3917_v14  ;;  %v301_v52 = vand.u32 4294901760, %v300_v61 }
  0x2e   :  { %3187 = vmatprep.mubr.f32.mxu0 %v281_v62  ;;  %v5271_v8 = vand.u32 4294901760, %v4112_v41  ;;  %v102_v9 = vsel %vm49_vm0, %v44_v10, 0  ;;  %v105_v19 = vsel %vm49_vm0, %v45_v4, 0  ;;  %v3380_v55 = vpack.c.bf16 %v3925_v18, %v3923_v17 }
  0x2f   :  { %v329_v40 = vand.u32 4294901760, %v4122_v5  ;;  %v5272_v33 = vand.u32 4294901760, %v4125_v51  ;;  %v4134_v53 = vand.u32 4294901760, %v102_v9  ;;  %v4136_v60 = vand.u32 4294901760, %v105_v19 }
  0x30   :  { %v320_v14 = vsub.f32 %v4112_v41, %v5271_v8  ;;  %v108_v49 = vsel %vm49_vm0, %v46_v50, 0  ;;  %v4148_v62 = vpack.c.bf16 %v387_v26, %v380_v25  ;;  %v311_v61 = vand.u32 4294901760, %v310_v34  ;;  %3381 = vmatprep.subr.bf16.mxu0 %v3380_v55 }
  0x31   :  { %3188 = vmatmul.mubr.f32.gmra.mrb[10].mxu0 %v291_v31  ;;  %v330_v10 = vsub.f32 %v4122_v5, %v329_v40  ;;  %v4154_v4 = vsub.f32 %v102_v9, %v4134_v53  ;;  %v4157_v50 = vsub.f32 %v105_v19, %v4136_v60  ;;  %v340_v17 = vsub.f32 %v4125_v51, %v5272_v33 }
  0x32   :  { %3190 = vmatprep.mubr.f32.mxu0 %v301_v52  ;;  %v321_v8 = vand.u32 4294901760, %v320_v14  ;;  %v4162_v18 = vand.u32 4294901760, %v108_v49  ;;  %vm1412_vm1 = vcmask 261120   ;;  %vm2840_vm2 = vcmask 1041408  }
  0x33   :  { %v349_v25 = vand.u32 4294901760, %v4154_v4  ;;  %v359_v26 = vand.u32 4294901760, %v4157_v50  ;;  %v331_v34 = vand.u32 4294901760, %v330_v10  ;;  %v341_v9 = vand.u32 4294901760, %v340_v17 }
  0x34   :  { %v4167_v31 = vsub.f32 %v108_v49, %v4162_v18  ;;  %vm2867_vm3 = vcmask 1043456   ;;  %vm2983_vm4 = vcmask 76800   ;;  %vm2976_vm5 = vcmask 80896  }
  0x35   :  { %3191 = vmatmul.mubr.f32.gmra.mrb[12].mxu0 %v311_v61  ;;  %v350_v52 = vsub.f32 %v4154_v4, %v349_v25  ;;  %v360_v19 = vsub.f32 %v4157_v50, %v359_v26  ;;  %vm2998_vm6 = vcmask 1045504   ;;  %vm3013_vm7 = vcmask 7168  }
  0x36   :  { %3193 = vmatprep.mubr.f32.mxu0 %v321_v8  ;;  %v369_v14 = vand.u32 4294901760, %v4167_v31  ;;  %vm3015_vm8 = vcmask 8192  }
  0x37   :  { %v351_v33 = vand.u32 4294901760, %v350_v52  ;;  %v361_v61 = vand.u32 4294901760, %v360_v19 }
  0x38   :  { %v370_v49 = vsub.f32 %v4167_v31, %v369_v14 }
  0x39   :  { %3194 = vmatmul.mubr.f32.gmra.mrb[14].mxu0 %v331_v34 }
  0x3a   :  { %3196 = vmatprep.mubr.f32.mxu0 %v341_v9  ;;  %v371_v10 = vand.u32 4294901760, %v370_v49 }
  0x3d   :  { %3197 = vmatmul.mubr.f32.gmra.mrb[16].mxu0 %v351_v33 }
  0x3e   :  { %3199 = vmatprep.mubr.f32.mxu0 %v361_v61 }
  0x41   :  { %3200 = vmatmul.mubr.f32.gmra.mrb[18].mxu0 %v371_v10 }
  0x42   :  { %3206 = vmatprep.mubr.f32.mxu0 %v3908_v11 }
  0x45   :  { %3207 = vmatmul.mubr.f32.vlgmr.msra.gmra.mrb[0].mxu0 %v3921_v16 }
  0x46   :  { %3383 = vmatpush3.bf16.msra.mxu0 %v3380_v55  ;;  %3209 = vmatprep.mubr.f32.mxu0 %v3935_v21 }
  0x47   :  { %3385 = vmatprep.subr.bf16.mxu0 %v3919_v15 }
  0x49   :  { %3210 = vmatmul.mubr.f32.gmra.mrb[2].mxu0 %v3947_v27 }
  0x4a   :  { %3212 = vmatprep.mubr.f32.mxu0 %v3954_v30 }
  0x4d   :  { %3213 = vmatmul.mubr.f32.gmra.mrb[4].mxu0 %v3975_v39 }
  0x4e   :  { %3215 = vmatprep.mubr.f32.mxu0 %v4007_v57 }
  0x51   :  { %3216 = vmatmul.mubr.f32.gmra.mrb[6].mxu0 %v4020_v1 }
  0x52   :  { %3218 = vmatprep.mubr.f32.mxu0 %v4022_v2 }
  0x55   :  { %3219 = vmatmul.mubr.f32.gmra.mrb[8].mxu0 %v4033_v22 }
  0x56   :  { %3221 = vmatprep.mubr.f32.mxu0 %v4049_v43 }
  0x59   :  { %3222 = vmatmul.mubr.f32.gmra.mrb[10].mxu0 %v4052_v46 }
  0x5a   :  { %3224 = vmatprep.mubr.f32.mxu0 %v4070_v59 }
  0x5d   :  { %3225 = vmatmul.mubr.f32.gmra.mrb[12].mxu0 %v4077_v3 }
  0x5e   :  { %3227 = vmatprep.mubr.f32.mxu0 %v4101_v63 }
  0x61   :  { %3228 = vmatmul.mubr.f32.gmra.mrb[14].mxu0 %v4107_v6 }
  0x62   :  { %3230 = vmatprep.mubr.f32.mxu0 %v4109_v45 }
  0x65   :  { %3231 = vmatmul.mubr.f32.gmra.mrb[16].mxu0 %v4134_v53 }
  0x66   :  { %3233 = vmatprep.mubr.f32.mxu0 %v4136_v60 }
  0x69   :  { %3234 = vmatmul.mubr.f32.gmra.mrb[18].mxu0 %v4162_v18 }
  0x6a   :  { %3240 = vmatprep.mubr.f32.mxu0 %v3933_v20  ;;  %v5311_v20 = vand.u32 4294901760, %v4031_v13 }
  0x6d   :  { %3241 = vmatmul.mubr.f32.vlgmr.msra.gmra.mrb[0].mxu0 %v3943_v24  ;;  %v5312_v24 = vand.u32 4294901760, %v4036_v23 }
  0x6e   :  { %3387 = vmatpush3.bf16.msra.mxu0 %v3919_v15  ;;  %3243 = vmatprep.mubr.f32.mxu0 %v3952_v29  ;;  %v5314_v29 = vand.u32 4294901760, %v4062_v54 }
  0x6f   :  { %3389 = vmatprep.subr.bf16.mxu0 %v4148_v62 }
  0x71   :  { %3244 = vmatmul.mubr.f32.gmra.mrb[2].mxu0 %v3966_v35  ;;  %v5316_v35 = vand.u32 4294901760, %v4081_v7 }
  0x72   :  { %3246 = vmatprep.mubr.f32.mxu0 %v3973_v38  ;;  %v5318_v38 = vand.u32 4294901760, %v4112_v41 }
  0x75   :  { %3247 = vmatmul.mubr.f32.gmra.mrb[4].mxu0 %v3991_v48 }
  0x76   :  { %3249 = vmatprep.mubr.f32.mxu0 %v4018_v0 }
  0x79   :  { %3250 = vmatmul.mubr.f32.gmra.mrb[6].mxu0 %v4031_v13 }
  0x7a   :  { %3252 = vmatprep.mubr.f32.mxu0 %v4036_v23 }
  0x7d   :  { %3253 = vmatmul.mubr.f32.gmra.mrb[8].mxu0 %v4047_v42 }
  0x7e   :  { %3255 = vmatprep.mubr.f32.mxu0 %v4062_v54 }
  0x81   :  { %3256 = vmatmul.mubr.f32.gmra.mrb[10].mxu0 %v4068_v58 }
  0x82   :  { %3258 = vmatprep.mubr.f32.mxu0 %v4081_v7 }
  0x85   :  { %3259 = vmatmul.mubr.f32.gmra.mrb[12].mxu0 %v4089_v36 }
  0x86   :  { %3261 = vmatprep.mubr.f32.mxu0 %v4112_v41 }
  0x89   :  { %3262 = vmatmul.mubr.f32.gmra.mrb[14].mxu0 %v4122_v5 }
  0x8a   :  { %3264 = vmatprep.mubr.f32.mxu0 %v4125_v51 }
  0x8d   :  { %3265 = vmatmul.mubr.f32.gmra.mrb[16].mxu0 %v4154_v4 }
  0x8e   :  { %3267 = vmatprep.mubr.f32.mxu0 %v4157_v50 }
  0x91   :  { %3268 = vmatmul.mubr.f32.gmra.mrb[18].mxu0 %v4167_v31 }
  0x92   :  { %3274 = vmatprep.mubr.f32.mxu0 %v179_v28  ;;  %v5313_v28 = vand.u32 4294901760, %v4047_v42 }
  0x95   :  { %3275 = vmatmul.mubr.f32.vlgmr.msra.gmra.mrb[0].mxu0 %v189_v32  ;;  %v5315_v32 = vand.u32 4294901760, %v4068_v58 }
  0x96   :  { %3391 = vmatpush3.bf16.msra.mxu0 %v4148_v62  ;;  %3277 = vmatprep.mubr.f32.mxu0 %v199_v37  ;;  %v5317_v37 = vand.u32 4294901760, %v4089_v36 }
  0x97   :  { %3393 = vmatprep.subr.bf16.mxu0 %v3919_v15 }
  0x99   :  { %3278 = vmatmul.mubr.f32.gmra.mrb[2].mxu0 %v209_v44  ;;  %v5319_v44 = vand.u32 4294901760, %v4125_v51 }
  0x9a   :  { %3280 = vmatprep.mubr.f32.mxu0 %v219_v47 }
  0x9d   :  { %3281 = vmatmul.mubr.f32.gmra.mrb[4].mxu0 %v229_v56 }
  0x9e   :  { %3283 = vmatprep.mubr.f32.mxu0 %v239_v12 }
  0xa1   :  { %3284 = vmatmul.mubr.f32.gmra.mrb[6].mxu0 %v5311_v20 }
  0xa2   :  { %3286 = vmatprep.mubr.f32.mxu0 %v5312_v24 }
  0xa5   :  { %3287 = vmatmul.mubr.f32.gmra.mrb[8].mxu0 %v5313_v28 }
  0xa6   :  { %3289 = vmatprep.mubr.f32.mxu0 %v5314_v29 }
  0xa9   :  { %3290 = vmatmul.mubr.f32.gmra.mrb[10].mxu0 %v5315_v32 }
  0xaa   :  { %3292 = vmatprep.mubr.f32.mxu0 %v5316_v35 }
  0xad   :  { %3293 = vmatmul.mubr.f32.gmra.mrb[12].mxu0 %v5317_v37 }
  0xae   :  { %3295 = vmatprep.mubr.f32.mxu0 %v5318_v38 }
  0xb1   :  { %3296 = vmatmul.mubr.f32.gmra.mrb[14].mxu0 %v329_v40 }
  0xb2   :  { %3298 = vmatprep.mubr.f32.mxu0 %v5319_v44 }
  0xb5   :  { %3299 = vmatmul.mubr.f32.gmra.mrb[16].mxu0 %v349_v25 }
  0xb6   :  { %3301 = vmatprep.mubr.f32.mxu0 %v359_v26 }
  0xb9   :  { %3302 = vmatmul.mubr.f32.gmra.mrb[18].mxu0 %v369_v14 }
  0xba   :  { %3308 = vmatprep.mubr.f32.mxu0 %v3908_v11 }
  0xbd   :  { %3309 = vmatmul.mubr.f32.vlgmr.msra.gmra.mrb[0].mxu0 %v3921_v16 }
  0xbe   :  { %3395 = vmatpush3.bf16.msra.mxu0 %v3919_v15  ;;  %3311 = vmatprep.mubr.f32.mxu0 %v3935_v21  ;;  %v1387_v15 = vld [vmem:[%s5262_s4 + $0x8] sm:$0xff] }
  0xc1   :  { %3312 = vmatmul.mubr.f32.gmra.mrb[2].mxu0 %v3947_v27 }
  0xc2   :  { %3314 = vmatprep.mubr.f32.mxu0 %v3954_v30 }
  0xc5   :  { %3315 = vmatmul.mubr.f32.gmra.mrb[4].mxu0 %v3975_v39 }
  0xc6   :  { %3317 = vmatprep.mubr.f32.mxu0 %v4007_v57 }
  0xc9   :  { %3318 = vmatmul.mubr.f32.gmra.mrb[6].mxu0 %v4020_v1 }
  0xca   :  { %3320 = vmatprep.mubr.f32.mxu0 %v4022_v2 }
  0xcd   :  { %3321 = vmatmul.mubr.f32.gmra.mrb[8].mxu0 %v4033_v22 }
  0xce   :  { %3323 = vmatprep.mubr.f32.mxu0 %v4049_v43 }
  0xd1   :  { %3324 = vmatmul.mubr.f32.gmra.mrb[10].mxu0 %v4052_v46 }
  0xd2   :  { %3326 = vmatprep.mubr.f32.mxu0 %v4070_v59 }
  0xd5   :  { %3327 = vmatmul.mubr.f32.gmra.mrb[12].mxu0 %v4077_v3 }
  0xd6   :  { %3329 = vmatprep.mubr.f32.mxu0 %v4101_v63 }
  0xd9   :  { %3330 = vmatmul.mubr.f32.gmra.mrb[14].mxu0 %v4107_v6 }
  0xda   :  { %3332 = vmatprep.mubr.f32.mxu0 %v4109_v45 }
  0xdd   :  { %3333 = vmatmul.mubr.f32.gmra.mrb[16].mxu0 %v4134_v53 }
  0xde   :  { %3335 = vmatprep.mubr.f32.mxu0 %v4136_v60 }
  0xe1   :  { %3336 = vmatmul.mubr.f32.gmra.mrb[18].mxu0 %v4162_v18 }
  0xe2   :  { %3342 = vmatprep.mubr.f32.mxu0 %v3908_v11  ;;  %v5273_v11 = vmov 0.0|0.0  }
  0xe3   :  { %3396 = vmatprep.subr.bf16.mxu0 %v5273_v11  ;;  %3426 = vmatprep.subr.bf16.mxu1 %v5273_v11 }
  0xe5   :  { %3343 = vmatmul.mubr.f32.vlgmr.msra.gmra.mrb[0].mxu0 %v3921_v16  ;;  %v4311_v16 = vsel %vm1412_vm1, %v1387_v15, 0 }
  0xe6   :  { %3345 = vmatprep.mubr.f32.mxu0 %v3935_v21  ;;  %v4314_v21 = vand.u32 4294901760, %v4311_v16 }
  0xe8   :  { %1897 = vmatprep.mubr.f32.mxu1 %v4314_v21 }
  0xe9   :  { %3346 = vmatmul.mubr.f32.gmra.mrb[2].mxu0 %v3947_v27 }
  0xea   :  { %3348 = vmatprep.mubr.f32.mxu0 %v3954_v30 }
  0xed   :  { %3349 = vmatmul.mubr.f32.gmra.mrb[4].mxu0 %v3975_v39 }
  0xee   :  { %3351 = vmatprep.mubr.f32.mxu0 %v4007_v57 }
  0xf1   :  { %3352 = vmatmul.mubr.f32.gmra.mrb[6].mxu0 %v4020_v1 }
  0xf2   :  { %3354 = vmatprep.mubr.f32.mxu0 %v4022_v2 }
  0xf5   :  { %3355 = vmatmul.mubr.f32.gmra.mrb[8].mxu0 %v4033_v22 }
  0xf6   :  { %3357 = vmatprep.mubr.f32.mxu0 %v4049_v43 }
  0xf9   :  { %3358 = vmatmul.mubr.f32.gmra.mrb[10].mxu0 %v4052_v46 }
  0xfa   :  { %3360 = vmatprep.mubr.f32.mxu0 %v4070_v59 }
  0xfd   :  { %3361 = vmatmul.mubr.f32.gmra.mrb[12].mxu0 %v4077_v3 }
  0xfe   :  { %3363 = vmatprep.mubr.f32.mxu0 %v4101_v63 }
 0x101   :  { %3364 = vmatmul.mubr.f32.gmra.mrb[14].mxu0 %v4107_v6 }
 0x102   :  { %3366 = vmatprep.mubr.f32.mxu0 %v4109_v45 }
 0x105   :  { %3367 = vmatmul.mubr.f32.gmra.mrb[16].mxu0 %v4134_v53 }
 0x106   :  { %3369 = vmatprep.mubr.f32.mxu0 %v4136_v60 }
 0x109   :  { %3370 = vmatmul.mubr.f32.gmra.mrb[18].mxu0 %v4162_v18 }
 0x1b8   :  { %v3344_v27 = vpop.f32.mrb[0].mxu0 }
 0x1b9   :  { %v1456_v30 = vand.u32 4294901760, %v3344_v27  ;;  %v1268_v39 = vpop.f32.mrb[1].mxu0 }
 0x1ba   :  { %v1453_v47 = vand.u32 4294901760, %v1268_v39 }
 0x1bb   :  { %v4317_v48 = vsub.f32 %v3344_v27, %v1456_v30 }
 0x1bc   :  { %v4319_v56 = vpack.c.bf16 %v1456_v30, %v1453_v47  ;;  %v4321_v57 = vsub.f32 %v1268_v39, %v1453_v47  ;;  %v3347_v0 = vpop.f32.mrb[2].mxu0 }
 0x1bd   :  { %v1462_v1 = vand.u32 4294901760, %v3347_v0  ;;  %v1280_v2 = vpop.f32.mrb[3].mxu0  ;;  %v1742_v12 = vand.u32 4294901760, %v4317_v48 }
 0x1be   :  { %v3457_v13 = vpack.c.bf16 %v4317_v48, %v4321_v57  ;;  %v1459_v22 = vand.u32 4294901760, %v1280_v2  ;;  %3398 = vmatpush1.bf16.msra.mxu0 %v4319_v56  ;;  %v1735_v23 = vand.u32 4294901760, %v4321_v57 }
 0x1bf   :  { %v4328_v41 = vsub.f32 %v3347_v0, %v1462_v1  ;;  %3399 = vmatprep.subr.bf16.mxu0 %v5273_v11  ;;  %v1743_v42 = vsub.f32 %v4317_v48, %v1742_v12  ;;  %v1395_v48 = vld [vmem:[%s5262_s4 + $0x48] sm:$0xff] }
 0x1c0   :  { %v4332_v43 = vpack.c.bf16 %v1462_v1, %v1459_v22  ;;  %v4334_v45 = vsub.f32 %v1280_v2, %v1459_v22  ;;  %v3350_v46 = vpop.f32.mrb[4].mxu0  ;;  %v1736_v54 = vsub.f32 %v4321_v57, %v1735_v23  ;;  %v4337_v58 = vpack.c.bf16 %v1742_v12, %v1735_v23 }
 0x1c1   :  { %v1756_v59 = vand.u32 4294901760, %v4328_v41  ;;  %v1468_v63 = vand.u32 4294901760, %v3350_v46  ;;  %v1292_v3 = vpop.f32.mrb[5].mxu0  ;;  %v1744_v6 = vand.u32 4294901760, %v1743_v42 }
 0x1c2   :  { %5320 = vst [vmem:[#allocation8_spill] sm:$0xff] %v4337_v58  ;;  %v1749_v7 = vand.u32 4294901760, %v4334_v45  ;;  %v3460_v36 = vpack.c.bf16 %v4328_v41, %v4334_v45  ;;  %v1465_v51 = vand.u32 4294901760, %v1292_v3  ;;  %3401 = vmatpush1.bf16.msra.mxu0 %v4332_v43  ;;  %v1737_v60 = vand.u32 4294901760, %v1736_v54 }
 0x1c3   :  { %v1757_v5 = vsub.f32 %v4328_v41, %v1756_v59  ;;  %v4345_v8 = vsub.f32 %v3350_v46, %v1468_v63  ;;  %3402 = vmatprep.subr.bf16.mxu0 %v5273_v11  ;;  %v1397_v41 = vld [vmem:[%s5262_s4 + $0x58] sm:$0xff]  ;;  %v4796_v58 = vsub.f32 %v4311_v16, %v4314_v21 }
 0x1c4   :  { %v1750_v40 = vsub.f32 %v4334_v45, %v1749_v7  ;;  %v4349_v33 = vpack.c.bf16 %v1468_v63, %v1465_v51  ;;  %v4351_v53 = vsub.f32 %v1292_v3, %v1465_v51  ;;  %v3353_v55 = vpop.f32.mrb[6].mxu0  ;;  %v3427_v62 = vpack.c.bf16 %v1744_v6, %v1737_v60 }
 0x1c5   :  { %v1770_v4 = vand.u32 4294901760, %v4345_v8  ;;  %v1474_v50 = vand.u32 4294901760, %v3353_v55  ;;  %v1304_v17 = vpop.f32.mrb[7].mxu0  ;;  %v1758_v18 = vand.u32 4294901760, %v1757_v5  ;;  %v4354_v25 = vpack.c.bf16 %v1756_v59, %v1749_v7 }
 0x1c6   :  { %v1763_v26 = vand.u32 4294901760, %v4351_v53  ;;  %v3463_v31 = vpack.c.bf16 %v4345_v8, %v4351_v53  ;;  %v1471_v34 = vand.u32 4294901760, %v1304_v17  ;;  %3404 = vmatpush1.bf16.msra.mxu0 %v4349_v33  ;;  %3428 = vmatpush1.bf16.msra.mxu1 %v3427_v62  ;;  %v1751_v52 = vand.u32 4294901760, %v1750_v40 }
 0x1c7   :  { %5321 = vst [vmem:[#allocation9_spill] sm:$0xff] %v4354_v25  ;;  %v1771_v9 = vsub.f32 %v4345_v8, %v1770_v4  ;;  %v4363_v19 = vsub.f32 %v3353_v55, %v1474_v50  ;;  %3405 = vmatprep.subr.bf16.mxu0 %v5273_v11  ;;  %3429 = vmatprep.subr.bf16.mxu1 %v5273_v11  ;;  %v1399_v8 = vld [vmem:[%s5262_s4 + $0x68] sm:$0xff] }
 0x1c8   :  { %v1764_v14 = vsub.f32 %v4351_v53, %v1763_v26  ;;  %v4370_v49 = vpack.c.bf16 %v1474_v50, %v1471_v34  ;;  %v4372_v61 = vsub.f32 %v1304_v17, %v1471_v34  ;;  %v3356_v10 = vpop.f32.mrb[8].mxu0  ;;  %v3430_v20 = vpack.c.bf16 %v1758_v18, %v1751_v52 }
 0x1c9   :  { %v1784_v24 = vand.u32 4294901760, %v4363_v19  ;;  %v1480_v28 = vand.u32 4294901760, %v3356_v10  ;;  %v1316_v29 = vpop.f32.mrb[9].mxu0  ;;  %v1772_v32 = vand.u32 4294901760, %v1771_v9 }
 0x1ca   :  { %v1777_v35 = vand.u32 4294901760, %v4372_v61  ;;  %v3466_v37 = vpack.c.bf16 %v4363_v19, %v4372_v61  ;;  %v1477_v38 = vand.u32 4294901760, %v1316_v29  ;;  %3407 = vmatpush1.bf16.msra.mxu0 %v4370_v49  ;;  %3431 = vmatpush1.bf16.msra.mxu1 %v3430_v20  ;;  %v1765_v44 = vand.u32 4294901760, %v1764_v14 }
 0x1cb   :  { %v1785_v15 = vsub.f32 %v4363_v19, %v1784_v24  ;;  %v4382_v27 = vsub.f32 %v3356_v10, %v1480_v28  ;;  %3408 = vmatprep.subr.bf16.mxu0 %v5273_v11  ;;  %3432 = vmatprep.subr.bf16.mxu1 %v5273_v11  ;;  %v1401_v19 = vld [vmem:[%s5262_s4 + $0x78] sm:$0xff] }
 0x1cc   :  { %v1778_v30 = vsub.f32 %v4372_v61, %v1777_v35  ;;  %v4389_v39 = vpack.c.bf16 %v1480_v28, %v1477_v38  ;;  %v4391_v47 = vsub.f32 %v1316_v29, %v1477_v38  ;;  %v3359_v0 = vpop.f32.mrb[10].mxu0  ;;  %v3433_v1 = vpack.c.bf16 %v1772_v32, %v1765_v44 }
 0x1cd   :  { %v1798_v2 = vand.u32 4294901760, %v4382_v27  ;;  %v1486_v12 = vand.u32 4294901760, %v3359_v0  ;;  %v1328_v22 = vpop.f32.mrb[11].mxu0  ;;  %v1786_v23 = vand.u32 4294901760, %v1785_v15 }
 0x1ce   :  { %v1791_v42 = vand.u32 4294901760, %v4391_v47  ;;  %v3469_v46 = vpack.c.bf16 %v4382_v27, %v4391_v47  ;;  %v1483_v54 = vand.u32 4294901760, %v1328_v22  ;;  %3410 = vmatpush1.bf16.msra.mxu0 %v4389_v39  ;;  %3434 = vmatpush1.bf16.msra.mxu1 %v3433_v1  ;;  %v1779_v59 = vand.u32 4294901760, %v1778_v30 }
 0x1cf   :  { %v1799_v63 = vsub.f32 %v4382_v27, %v1798_v2  ;;  %v4401_v3 = vsub.f32 %v3359_v0, %v1486_v12  ;;  %3411 = vmatprep.subr.bf16.mxu0 %v5273_v11  ;;  %3435 = vmatprep.subr.bf16.mxu1 %v5273_v11  ;;  %v4436_v0 = vpack.c.bf16 %v1770_v4, %v1763_v26  ;;  %v1403_v27 = vld [vmem:[%s5262_s4 + $0x88] sm:$0xff] }
 0x1d0   :  { %v1792_v6 = vsub.f32 %v4391_v47, %v1791_v42  ;;  %v4408_v7 = vpack.c.bf16 %v1486_v12, %v1483_v54  ;;  %v4410_v51 = vsub.f32 %v1328_v22, %v1483_v54  ;;  %v3362_v60 = vpop.f32.mrb[12].mxu0  ;;  %v3436_v5 = vpack.c.bf16 %v1786_v23, %v1779_v59 }
 0x1d1   :  { %v1812_v40 = vand.u32 4294901760, %v4401_v3  ;;  %v1492_v55 = vand.u32 4294901760, %v3362_v60  ;;  %v1340_v62 = vpop.f32.mrb[13].mxu0  ;;  %v1800_v50 = vand.u32 4294901760, %v1799_v63  ;;  %5323 = vst [vmem:[#allocation11_spill] sm:$0xff] %v4436_v0 }
 0x1d2   :  { %v1805_v17 = vand.u32 4294901760, %v4410_v51  ;;  %v1489_v34 = vand.u32 4294901760, %v1340_v62  ;;  %3413 = vmatpush1.bf16.msra.mxu0 %v4408_v7  ;;  %3437 = vmatpush1.bf16.msra.mxu1 %v3436_v5  ;;  %v1793_v52 = vand.u32 4294901760, %v1792_v6 }
 0x1d3   :  { %v1813_v9 = vsub.f32 %v4401_v3, %v1812_v40  ;;  %v4420_v14 = vsub.f32 %v3362_v60, %v1492_v55  ;;  %3414 = vmatprep.subr.bf16.mxu0 %v5273_v11  ;;  %3438 = vmatprep.subr.bf16.mxu1 %v5273_v11 }
 0x1d4   :  { %v1806_v10 = vsub.f32 %v4410_v51, %v1805_v17  ;;  %v4427_v20 = vpack.c.bf16 %v1492_v55, %v1489_v34  ;;  %v4429_v28 = vsub.f32 %v1340_v62, %v1489_v34  ;;  %v3365_v29 = vpop.f32.mrb[14].mxu0  ;;  %v3439_v32 = vpack.c.bf16 %v1800_v50, %v1793_v52 }
 0x1d5   :  { %v1826_v38 = vand.u32 4294901760, %v4420_v14  ;;  %v1498_v44 = vand.u32 4294901760, %v3365_v29  ;;  %v1352_v15 = vpop.f32.mrb[15].mxu0  ;;  %v1814_v30 = vand.u32 4294901760, %v1813_v9  ;;  %v4457_v34 = vpack.c.bf16 %v1784_v24, %v1777_v35 }
 0x1d6   :  { %5322 = vst [vmem:[#allocation10_spill] sm:$0xff] %v4427_v20  ;;  %v1819_v1 = vand.u32 4294901760, %v4429_v28  ;;  %v1495_v22 = vand.u32 4294901760, %v1352_v15  ;;  %3416 = vmatpush1.bf16.msra.mxu0 %v4427_v20  ;;  %3440 = vmatpush1.bf16.msra.mxu1 %v3439_v32  ;;  %v1807_v23 = vand.u32 4294901760, %v1806_v10 }
 0x1d7   :  { %v1827_v54 = vsub.f32 %v4420_v14, %v1826_v38  ;;  %v4443_v59 = vsub.f32 %v3365_v29, %v1498_v44  ;;  %3417 = vmatprep.subr.bf16.mxu0 %v5273_v11  ;;  %3441 = vmatprep.subr.bf16.mxu1 %v5273_v11  ;;  %5324 = vst [vmem:[#allocation12_spill] sm:$0xff] %v4457_v34 }
 0x1d8   :  { %v1820_v4 = vsub.f32 %v4429_v28, %v1819_v1  ;;  %v4448_v26 = vpack.c.bf16 %v1498_v44, %v1495_v22  ;;  %v4450_v63 = vsub.f32 %v1352_v15, %v1495_v22  ;;  %v3368_v6 = vpop.f32.mrb[16].mxu0  ;;  %v3442_v60 = vpack.c.bf16 %v1814_v30, %v1807_v23 }
 0x1d9   :  { %v1840_v5 = vand.u32 4294901760, %v4443_v59  ;;  %v1504_v55 = vand.u32 4294901760, %v3368_v6  ;;  %v1364_v62 = vpop.f32.mrb[17].mxu0  ;;  %v1828_v50 = vand.u32 4294901760, %v1827_v54 }
 0x1da   :  { %v1833_v52 = vand.u32 4294901760, %v4450_v63  ;;  %v1501_v10 = vand.u32 4294901760, %v1364_v62  ;;  %3419 = vmatpush1.bf16.msra.mxu0 %v4448_v26  ;;  %3443 = vmatpush1.bf16.msra.mxu1 %v3442_v60  ;;  %v1821_v29 = vand.u32 4294901760, %v1820_v4 }
 0x1db   :  { %v1841_v32 = vsub.f32 %v4443_v59, %v1840_v5  ;;  %v4464_v44 = vsub.f32 %v3368_v6, %v1504_v55  ;;  %3420 = vmatprep.subr.bf16.mxu0 %v5273_v11  ;;  %3444 = vmatprep.subr.bf16.mxu1 %v5273_v11  ;;  %v4478_v6 = vpack.c.bf16 %v1798_v2, %v1791_v42 }
 0x1dc   :  { %v1834_v24 = vsub.f32 %v4450_v63, %v1833_v52  ;;  %v4469_v35 = vpack.c.bf16 %v1504_v55, %v1501_v10  ;;  %v4471_v15 = vsub.f32 %v1364_v62, %v1501_v10  ;;  %v3371_v30 = vpop.f32.mrb[18].mxu0  ;;  %v3445_v22 = vpack.c.bf16 %v1828_v50, %v1821_v29 }
 0x1dd   :  { %v1854_v23 = vand.u32 4294901760, %v4464_v44  ;;  %v1510_v54 = vand.u32 4294901760, %v3371_v30  ;;  %v1376_v4 = vpop.f32.mrb[19].mxu0  ;;  %v1842_v60 = vand.u32 4294901760, %v1841_v32  ;;  %5325 = vst [vmem:[#allocation13_spill] sm:$0xff] %v4478_v6 }
 0x1de   :  { %v1847_v9 = vand.u32 4294901760, %v4471_v15  ;;  %v1507_v62 = vand.u32 4294901760, %v1376_v4  ;;  %3422 = vmatpush1.bf16.msra.mxu0 %v4469_v35  ;;  %3446 = vmatpush1.bf16.msra.mxu1 %v3445_v22  ;;  %v1835_v50 = vand.u32 4294901760, %v1834_v24  ;;  %v4499_v24 = vpack.c.bf16 %v1812_v40, %v1805_v17 }
 0x1df   :  { %v1855_v10 = vsub.f32 %v4464_v44, %v1854_v23  ;;  %v4485_v29 = vsub.f32 %v3371_v30, %v1510_v54  ;;  %3423 = vmatprep.subr.bf16.mxu0 %v5273_v11  ;;  %3447 = vmatprep.subr.bf16.mxu1 %v5273_v11  ;;  %v4501_v30 = vpack.c.bf16 %v1826_v38, %v1819_v1  ;;  %v1389_v38 = vld [vmem:[%s5262_s4 + $0x18] sm:$0xff] }
 0x1e0   :  { %v1848_v2 = vsub.f32 %v4471_v15, %v1847_v9  ;;  %v4490_v42 = vpack.c.bf16 %v1510_v54, %v1507_v62  ;;  %v4492_v32 = vsub.f32 %v1376_v4, %v1507_v62  ;;  %v3448_v55 = vpack.c.bf16 %v1842_v60, %v1835_v50  ;;  %5326 = vst [vmem:[#allocation14_spill] sm:$0xff] %v4499_v24 }
 0x1e1   :  { %v1868_v12 = vand.u32 4294901760, %v4485_v29  ;;  %v1856_v18 = vand.u32 4294901760, %v1855_v10  ;;  %5327 = vst [vmem:[#allocation15_spill] sm:$0xff] %v4501_v30  ;;  %v4509_v62 = vpack.c.bf16 %v1840_v5, %v1833_v52  ;;  %v4511_v50 = vpack.c.bf16 %v1854_v23, %v1847_v9  ;;  %v1391_v52 = vld [vmem:[%s5262_s4 + $0x28] sm:$0xff]  ;;  %v4540_v23 = vld [vmem:[%s5262_s4 + $0x10] sm:$0xff] }
 0x1e2   :  { %v1861_v22 = vand.u32 4294901760, %v4492_v32  ;;  %3425 = vmatpush1.bf16.msra.mxu0 %v4490_v42  ;;  %3449 = vmatpush1.bf16.msra.mxu1 %v3448_v55  ;;  %v1849_v4 = vand.u32 4294901760, %v1848_v2  ;;  %v4522_v2 = vld [vmem:[%s5262_s4] sm:$0xff]  ;;  %v4526_v5 = vsel %vm1412_vm1, %v1389_v38, 0 }
 0x1e3   :  { %v1869_v60 = vsub.f32 %v4485_v29, %v1868_v12  ;;  %3450 = vmatprep.subr.bf16.mxu1 %v5273_v11  ;;  %5328 = vst [vmem:[#allocation16_spill] sm:$0xff] %v4509_v62  ;;  %5329 = vst [vmem:[#allocation17_spill] sm:$0xff] %v4511_v50  ;;  %v4535_v9 = vand.u32 4294901760, %v4526_v5  ;;  %v5337_v50 = vmov 0.0|0.0  }
 0x1e4   :  { %v1862_v40 = vsub.f32 %v4492_v32, %v1861_v22  ;;  %v3451_v17 = vpack.c.bf16 %v1856_v18, %v1849_v4  ;;  %v4517_v1 = vpack.c.bf16 %v1868_v12, %v1861_v22  ;;  %v4532_v12 = vand.u32 4294901760, %v4522_v2  ;;  %v1393_v4 = vld [vmem:[%s5262_s4 + $0x38] sm:$0xff] }
 0x1e5   :  { %v1870_v10 = vand.u32 4294901760, %v1869_v60  ;;  %v4544_v22 = vsel %vm1412_vm1, %v1391_v52, 0  ;;  %v4551_v60 = vand.u32 4294901760, %v4540_v23  ;;  %v4567_v38 = vsel %vm1412_vm1, %v1393_v4, 0  ;;  %v4632_v4 = vld [vmem:[%s5262_s4 + $0x50] sm:$0xff] }
 0x1e6   :  { %5330 = vst [vmem:[#allocation18_spill] sm:$0xff] %v4517_v1  ;;  %3452 = vmatpush1.bf16.msra.mxu1 %v3451_v17  ;;  %v1863_v55 = vand.u32 4294901760, %v1862_v40  ;;  %v4558_v40 = vand.u32 4294901760, %v4544_v22  ;;  %v4563_v17 = vld [vmem:[%s5262_s4 + $0x20] sm:$0xff]  ;;  %v4613_v52 = vsel %vm1412_vm1, %v1397_v41, 0  ;;  %v4643_v61 = vand.u32 4294901760, %v4632_v4 }
 0x1e7   :  { %3453 = vmatprep.subr.bf16.mxu1 %v5273_v11  ;;  %v4574_v57 = vand.u32 4294901760, %v4563_v17  ;;  %v4655_v41 = vld [vmem:[%s5262_s4 + $0x60] sm:$0xff]  ;;  %v4682_v1 = vsel %vm1412_vm1, %v1403_v27, 0 }
 0x1e8   :  { %v3454_v18 = vpack.c.bf16 %v1870_v10, %v1863_v55  ;;  %v4586_v10 = vld [vmem:[%s5262_s4 + $0x30] sm:$0xff]  ;;  %v4590_v55 = vsel %vm1412_vm1, %v1395_v48, 0  ;;  %v4636_v48 = vsel %vm1412_vm1, %v1399_v8, 0  ;;  %v4659_v8 = vsel %vm1412_vm1, %v1401_v19, 0  ;;  %v4701_v27 = vld [vmem:[%s5262_s4 + $0x80] sm:$0xff] }
 0x1e9   :  { %v4597_v45 = vand.u32 4294901760, %v4586_v10  ;;  %v4666_v47 = vand.u32 4294901760, %v4655_v41  ;;  %v4673_v54 = vand.u32 4294901760, %v4659_v8  ;;  %v4678_v19 = vld [vmem:[%s5262_s4 + $0x70] sm:$0xff]  ;;  %v4817_v16 = vsub.f32 %v4544_v22, %v4558_v40 }
 0x1ea   :  { %3455 = vmatpush1.bf16.msra.mxu1 %v3454_v18  ;;  %v4609_v18 = vld [vmem:[%s5262_s4 + $0x40] sm:$0xff] }
 0x1eb   :  { %3456 = vmatprep.subr.bf16.mxu1 %v5273_v11  ;;  %v4620_v53 = vand.u32 4294901760, %v4609_v18  ;;  %5332 = vst [vmem:[#allocation20_spill] sm:$0xff] %v4666_v47  ;;  %5334 = vst [vmem:[#allocation21_spill] sm:$0xff] %v4673_v54 }
 0x1ed   :  { %1899 = vmatmul.mubr.f32.vlgmr.msra.gmra.mrb[0].mxu1 %v4532_v12 }
 0x1ee   :  { %3458 = vmatpush1.bf16.msra.mxu1 %v3457_v13  ;;  %1904 = vmatprep.mubr.f32.mxu1 %v4535_v9  ;;  %v4581_v13 = vand.u32 4294901760, %v4567_v38 }
 0x1ef   :  { %3459 = vmatprep.subr.bf16.mxu1 %v5273_v11 }
 0x1f1   :  { %1906 = vmatmul.mubr.f32.gmra.mrb[2].mxu1 %v4551_v60 }
 0x1f2   :  { %3461 = vmatpush1.bf16.msra.mxu1 %v3460_v36  ;;  %1911 = vmatprep.mubr.f32.mxu1 %v4558_v40  ;;  %v4604_v36 = vand.u32 4294901760, %v4590_v55 }
 0x1f3   :  { %3462 = vmatprep.subr.bf16.mxu1 %v5273_v11 }
 0x1f4   :  { %v4841_v22 = vsub.f32 %v4590_v55, %v4604_v36 }
 0x1f5   :  { %1913 = vmatmul.mubr.f32.gmra.mrb[4].mxu1 %v4574_v57 }
 0x1f6   :  { %3464 = vmatpush1.bf16.msra.mxu1 %v3463_v31  ;;  %1918 = vmatprep.mubr.f32.mxu1 %v4581_v13  ;;  %v4627_v31 = vand.u32 4294901760, %v4613_v52 }
 0x1f7   :  { %3465 = vmatprep.subr.bf16.mxu1 %v5273_v11 }
 0x1f9   :  { %1920 = vmatmul.mubr.f32.gmra.mrb[6].mxu1 %v4597_v45 }
 0x1fa   :  { %3467 = vmatpush1.bf16.msra.mxu1 %v3466_v37  ;;  %1925 = vmatprep.mubr.f32.mxu1 %v4604_v36  ;;  %v4650_v37 = vand.u32 4294901760, %v4636_v48 }
 0x1fb   :  { %3468 = vmatprep.subr.bf16.mxu1 %v5273_v11 }
 0x1fc   :  { %5331 = vst [vmem:[#allocation19_spill] sm:$0xff] %v4650_v37  ;;  %v4865_v55 = vsub.f32 %v4636_v48, %v4650_v37 }
 0x1fd   :  { %1927 = vmatmul.mubr.f32.gmra.mrb[8].mxu1 %v4620_v53 }
 0x1fe   :  { %3470 = vmatpush1.bf16.msra.mxu1 %v3469_v46  ;;  %1932 = vmatprep.mubr.f32.mxu1 %v4627_v31  ;;  %v5333_v46 = vpack.c.bf16 %v4401_v3, %v4410_v51  ;;  %v1405_v3 = vld [vmem:[%s5262_s4 + $0x98] sm:$0xff]  ;;  %v4689_v51 = vand.u32 4294901760, %v4678_v19 }
 0x1ff   :  { %3471 = vmatprep.subr.bf16.mxu1 %v5273_v11  ;;  %v4705_v62 = vsel %vm1412_vm1, %v1405_v3, 0  ;;  %v4724_v3 = vld [vmem:[%s5262_s4 + $0x90] sm:$0xff] }
 0x200   :  { %5335 = vst [vmem:[#allocation22_spill] sm:$0xff] %v4689_v51  ;;  %v4719_v30 = vand.u32 4294901760, %v4705_v62 }
 0x201   :  { %1934 = vmatmul.mubr.f32.gmra.mrb[10].mxu1 %v4643_v61 }
 0x202   :  { %3473 = vmatpush1.bf16.msra.mxu1 %v5333_v46  ;;  %1939 = vmatprep.mubr.f32.mxu1 %v4650_v37  ;;  %v5336_v46 = vpack.c.bf16 %v4420_v14, %v4429_v28  ;;  %v1407_v14 = vld [vmem:[%s5262_s4 + $0xa8] sm:$0xff]  ;;  %v4712_v28 = vand.u32 4294901760, %v4701_v27 }
 0x203   :  { %3474 = vmatprep.subr.bf16.mxu1 %v5273_v11  ;;  %v4696_v11 = vand.u32 4294901760, %v4682_v1  ;;  %v4728_v24 = vsel %vm1412_vm1, %v1407_v14, 0  ;;  %v4747_v14 = vld [vmem:[%s5262_s4 + $0xa0] sm:$0xff] }
 0x204   :  { %5338 = vst [vmem:[#allocation23_spill] sm:$0xff] %v4712_v28  ;;  %v4742_v6 = vand.u32 4294901760, %v4728_v24 }
 0x205   :  { %1941 = vmatmul.mubr.f32.gmra.mrb[12].mxu1 %v4666_v47 }
 0x206   :  { %3476 = vmatpush1.bf16.msra.mxu1 %v5336_v46  ;;  %1946 = vmatprep.mubr.f32.mxu1 %v4673_v54  ;;  %v5339_v46 = vpack.c.bf16 %v4443_v59, %v4450_v63  ;;  %v1409_v59 = vld [vmem:[%s5262_s4 + $0xb8] sm:$0xff]  ;;  %v4735_v63 = vand.u32 4294901760, %v4724_v3 }
 0x207   :  { %3477 = vmatprep.subr.bf16.mxu1 %v5337_v50  ;;  %v4751_v34 = vsel %vm1412_vm1, %v1409_v59, 0  ;;  %v4770_v59 = vld [vmem:[%s5262_s4 + $0xb0] sm:$0xff] }
 0x208   :  { %v4765_v0 = vand.u32 4294901760, %v4751_v34  ;;  %5344 = vst [vmem:[#allocation26_spill] sm:$0xff] %v4770_v59 }
 0x209   :  { %1948 = vmatmul.mubr.f32.gmra.mrb[14].mxu1 %v4689_v51 }
 0x20a   :  { %3479 = vmatpush1.bf16.msra.mxu1 %v5339_v46  ;;  %1953 = vmatprep.mubr.f32.mxu1 %v4696_v11  ;;  %v5340_v46 = vpack.c.bf16 %v4464_v44, %v4471_v15  ;;  %v1411_v44 = vld [vmem:[%s5262_s4 + $0xc8] sm:$0xf]  ;;  %v4758_v15 = vand.u32 4294901760, %v4747_v14  ;;  %5343 = vst [vmem:[#allocation25_spill] sm:$0xff] %v4765_v0 }
 0x20b   :  { %3480 = vmatprep.subr.bf16.mxu1 %v5337_v50  ;;  %v4773_v25 = vsel %vm1412_vm1, %v1411_v44, 0 }
 0x20c   :  { %5341 = vst [vmem:[#allocation24_spill] sm:$0xff] %v4758_v15  ;;  %5345 = vst [vmem:[#allocation27_spill] sm:$0xff] %v4773_v25 }
 0x20d   :  { %1955 = vmatmul.mubr.f32.gmra.mrb[16].mxu1 %v4712_v28 }
 0x20e   :  { %3482 = vmatpush1.bf16.msra.mxu1 %v5340_v46  ;;  %1960 = vmatprep.mubr.f32.mxu1 %v4719_v30  ;;  %v5342_v46 = vpack.c.bf16 %v4485_v29, %v4492_v32  ;;  %v4778_v29 = vand.u32 4294901760, %v4770_v59  ;;  %v4782_v32 = vand.u32 4294901760, %v4773_v25  ;;  %v4800_v25 = vsub.f32 %v4522_v2, %v4532_v12 }
 0x20f   :  { %3483 = vmatprep.subr.bf16.mxu1 %v5337_v50  ;;  %v4806_v59 = vsub.f32 %v4526_v5, %v4535_v9  ;;  %v4823_v2 = vsub.f32 %v4563_v17, %v4574_v57  ;;  %v4829_v5 = vsub.f32 %v4567_v38, %v4581_v13  ;;  %v4847_v17 = vsub.f32 %v4609_v18, %v4620_v53 }
 0x210   :  { %5346 = vst [vmem:[#allocation28_spill] sm:$0xff] %v4778_v29  ;;  %5347 = vst [vmem:[#allocation29_spill] sm:$0xff] %v4782_v32  ;;  %v4853_v38 = vsub.f32 %v4613_v52, %v4627_v31  ;;  %v4871_v18 = vsub.f32 %v4655_v41, %v4666_v47  ;;  %v4877_v52 = vsub.f32 %v4659_v8, %v4673_v54  ;;  %v5289_v48 = vand.u32 4294901760, %v4800_v25 }
 0x211   :  { %1962 = vmatmul.mubr.f32.gmra.mrb[18].mxu1 %v4735_v63  ;;  %v4885_v41 = vsub.f32 %v4678_v19, %v4689_v51  ;;  %v4894_v8 = vsub.f32 %v4682_v1, %v4696_v11  ;;  %v5288_v19 = vand.u32 4294901760, %v4806_v59 }
 0x212   :  { %3485 = vmatpush1.bf16.msra.mxu1 %v5342_v46  ;;  %1967 = vmatprep.mubr.f32.mxu1 %v4742_v6  ;;  %v4787_v46 = vld [vmem:[%s5262_s4 + $0xc0] sm:$0xf]  ;;  %v1545_v54 = vsub.f32 %v4800_v25, %v5289_v48  ;;  %s5085_s4 = sld [smem:[#allocation3 + $0x1]] }
 0x213   :  { %3486 = vmatprep.subr.bf16.mxu1 %v5337_v50  ;;  %5348 = vst [vmem:[#allocation30_spill] sm:$0xff] %v4787_v46  ;;  %v4791_v44 = vand.u32 4294901760, %v4787_v46  ;;  %v4811_v46 = vsub.f32 %v4540_v23, %v4551_v60  ;;  %v4835_v23 = vsub.f32 %v4586_v10, %v4597_v45  ;;  %v4859_v10 = vsub.f32 %v4632_v4, %v4643_v61 }
 0x214   :  { %v5286_v4 = vand.u32 4294901760, %v4796_v58  ;;  %v1554_v1 = vsub.f32 %v4806_v59, %v5288_v19  ;;  %v5295_v19 = vand.u32 4294901760, %v4823_v2 }
 0x215   :  { %1969 = vmatmul.mubr.f32.gmra.mrb[20].mxu1 %v4758_v15  ;;  %v5293_v37 = vand.u32 4294901760, %v4811_v46 }
 0x216   :  { %1974 = vmatprep.mubr.f32.mxu1 %v4765_v0  ;;  %v1539_v47 = vsub.f32 %v4796_v58, %v5286_v4  ;;  %v1546_v4 = vand.u32 4294901760, %v1545_v54 }
 0x217   :  { %v1560_v54 = vsub.f32 %v4811_v46, %v5293_v37  ;;  %v4945_v37 = vsub.f32 %v4747_v14, %v4758_v15  ;;  %v5301_v14 = vand.u32 4294901760, %v4841_v22 }
 0x218   :  { %v1540_v51 = vand.u32 4294901760, %v1539_v47  ;;  %v4914_v47 = vsub.f32 %v4705_v62, %v4719_v30  ;;  %s2837_s11 = smul.f32 0.01, %s5085_s4 }
 0x219   :  { %1976 = vmatmul.mubr.f32.gmra.mrb[22].mxu1 %v4778_v29  ;;  %v1561_v48 = vand.u32 4294901760, %v1560_v54  ;;  %s2845_s14 = smul.f32 0.03, %s5085_s4 }
 0x21a   :  { %1981 = vmatprep.mubr.f32.mxu1 %v4782_v32  ;;  %1541 = vmatprep.mubr.f32.mxu0 %v1540_v51  ;;  %v5292_v51 = vand.u32 4294901760, %v4817_v16  ;;  %s2838_s12 = smul.f32 %s2837_s11, %s2837_s11 }
 0x21b   :  { %1547 = vmatmul.mubr.f32.vlgmr.msra.gmra.mrb[20].mxu0 %v1546_v4  ;;  %v4934_v4 = vsub.f32 %v4728_v24, %v4742_v6  ;;  %s2846_s15 = smul.f32 %s2845_s14, %s2845_s14 }
 0x21c   :  { %v1569_v62 = vsub.f32 %v4817_v16, %v5292_v51 }
 0x21d   :  { %1983 = vmatmul.mubr.f32.gmra.mrb[24].mxu1 %v4791_v44 }
 0x21e   :  { %2094 = vmatprep.mubr.f32.mxu1 %v4796_v58  ;;  %v1570_v54 = vand.u32 4294901760, %v1569_v62 }
 0x221   :  { %2097 = vmatmul.mubr.f32.vlgmr.msra.gmra.mrb[0].mxu1 %v4800_v25 }
 0x222   :  { %3488 = vmatpush1.bf16.msra.mxu1 %v4319_v56  ;;  %2103 = vmatprep.mubr.f32.mxu1 %v4806_v59 }
 0x223   :  { %3489 = vmatprep.subr.bf16.mxu1 %v5337_v50 }
 0x225   :  { %2106 = vmatmul.mubr.f32.gmra.mrb[2].mxu1 %v4811_v46 }
 0x226   :  { %3491 = vmatpush1.bf16.msra.mxu1 %v4332_v43  ;;  %2112 = vmatprep.mubr.f32.mxu1 %v4817_v16 }
 0x227   :  { %3492 = vmatprep.subr.bf16.mxu1 %v5337_v50 }
 0x229   :  { %2115 = vmatmul.mubr.f32.gmra.mrb[4].mxu1 %v4823_v2 }
 0x22a   :  { %3494 = vmatpush1.bf16.msra.mxu1 %v4349_v33  ;;  %2121 = vmatprep.mubr.f32.mxu1 %v4829_v5 }
 0x22b   :  { %3495 = vmatprep.subr.bf16.mxu1 %v5337_v50 }
 0x22d   :  { %2124 = vmatmul.mubr.f32.gmra.mrb[6].mxu1 %v4835_v23 }
 0x22e   :  { %3497 = vmatpush1.bf16.msra.mxu1 %v4370_v49  ;;  %2130 = vmatprep.mubr.f32.mxu1 %v4841_v22 }
 0x22f   :  { %3498 = vmatprep.subr.bf16.mxu1 %v5337_v50 }
 0x231   :  { %2133 = vmatmul.mubr.f32.gmra.mrb[8].mxu1 %v4847_v17 }
 0x232   :  { %3500 = vmatpush1.bf16.msra.mxu1 %v4389_v39  ;;  %2139 = vmatprep.mubr.f32.mxu1 %v4853_v38 }
 0x233   :  { %3501 = vmatprep.subr.bf16.mxu1 %v5337_v50 }
 0x235   :  { %2142 = vmatmul.mubr.f32.gmra.mrb[10].mxu1 %v4859_v10 }
 0x236   :  { %3503 = vmatpush1.bf16.msra.mxu1 %v4408_v7  ;;  %2148 = vmatprep.mubr.f32.mxu1 %v4865_v55 }
 0x237   :  { %3504 = vmatprep.subr.bf16.mxu1 %v5337_v50 }
 0x239   :  { %2151 = vmatmul.mubr.f32.gmra.mrb[12].mxu1 %v4871_v18 }
 0x23a   :  { %3506 = vmatpush1.bf16.msra.mxu1 %v4427_v20  ;;  %2157 = vmatprep.mubr.f32.mxu1 %v4877_v52  ;;  %v4905_v20 = vsub.f32 %v4701_v27, %v4712_v28  ;;  %v1555_v27 = vand.u32 4294901760, %v1554_v1  ;;  %v4925_v28 = vsub.f32 %v4724_v3, %v4735_v63  ;;  %v1575_v1 = vsub.f32 %v4823_v2, %v5295_v19  ;;  %v5349_v19 = vld [vmem:[#allocation26_spill] sm:$0xff] }
 0x23b   :  { %3507 = vmatprep.subr.bf16.mxu1 %v5337_v50  ;;  %v5294_v3 = vand.u32 4294901760, %v4829_v5  ;;  %v4965_v15 = vsub.f32 %v5349_v19, %v4778_v29 }
 0x23c   :  { %1556 = vmatprep.mubr.f32.mxu0 %v1555_v27  ;;  %v5298_v27 = vand.u32 4294901760, %v4835_v23  ;;  %v1576_v51 = vand.u32 4294901760, %v1575_v1 }
 0x23d   :  { %2160 = vmatmul.mubr.f32.gmra.mrb[14].mxu1 %v4885_v41  ;;  %1562 = vmatmul.mubr.f32.gmra.mrb[22].mxu0 %v1561_v48  ;;  %v1584_v24 = vsub.f32 %v4829_v5, %v5294_v3  ;;  %v4954_v48 = vsub.f32 %v4751_v34, %v4765_v0  ;;  %v1599_v34 = vsub.f32 %v4841_v22, %v5301_v14  ;;  %v5351_v14 = vld [vmem:[#allocation30_spill] sm:$0xff] }
 0x23e   :  { %3509 = vmatpush1.bf16.msra.mxu1 %v4448_v26  ;;  %2166 = vmatprep.mubr.f32.mxu1 %v4894_v8  ;;  %v1590_v62 = vsub.f32 %v4835_v23, %v5298_v27  ;;  %v5350_v27 = vld [vmem:[#allocation27_spill] sm:$0xff]  ;;  %v4983_v0 = vsub.f32 %v5351_v14, %v4791_v44 }
 0x23f   :  { %3510 = vmatprep.subr.bf16.mxu1 %v5337_v50  ;;  %1571 = vmatprep.mubr.f32.mxu0 %v1570_v54  ;;  %v1585_v1 = vand.u32 4294901760, %v1584_v24  ;;  %v5304_v54 = vand.u32 4294901760, %v4847_v17  ;;  %v1600_v19 = vand.u32 4294901760, %v1599_v34  ;;  %v5309_v34 = vand.u32 4294901760, %v4865_v55 }
 0x240   :  { %v1591_v3 = vand.u32 4294901760, %v1590_v62  ;;  %v5308_v62 = vand.u32 4294901760, %v4853_v38 }
 0x241   :  { %2169 = vmatmul.mubr.f32.gmra.mrb[16].mxu1 %v4905_v20  ;;  %1577 = vmatmul.mubr.f32.gmra.mrb[24].mxu0 %v1576_v51  ;;  %v4973_v51 = vsub.f32 %v5350_v27, %v4782_v32  ;;  %v1605_v24 = vsub.f32 %v4847_v17, %v5304_v54  ;;  %v1634_v54 = vand.u32 4294901760, %v4871_v18  ;;  %v1629_v14 = vsub.f32 %v4865_v55, %v5309_v34 }
 0x242   :  { %3512 = vmatpush1.bf16.msra.mxu1 %v4469_v35  ;;  %2175 = vmatprep.mubr.f32.mxu1 %v4914_v47  ;;  %v1614_v27 = vsub.f32 %v4853_v38, %v5308_v62  ;;  %v5355_v34 = vand.u32 4294901760, %v4806_v59 }
 0x243   :  { %3513 = vmatprep.subr.bf16.mxu1 %v5337_v50  ;;  %1586 = vmatprep.mubr.f32.mxu0 %v1585_v1  ;;  %v5307_v1 = vand.u32 4294901760, %v4859_v10  ;;  %v1606_v29 = vand.u32 4294901760, %v1605_v24 }
 0x244   :  { %v1615_v24 = vand.u32 4294901760, %v1614_v27  ;;  %v1630_v27 = vand.u32 4294901760, %v1629_v14  ;;  %v1664_v14 = vand.u32 4294901760, %v4905_v20 }
 0x245   :  { %2178 = vmatmul.mubr.f32.gmra.mrb[18].mxu1 %v4925_v28  ;;  %1592 = vmatmul.mubr.f32.gmra.mrb[26].mxu0 %v1591_v3  ;;  %v1620_v3 = vsub.f32 %v4859_v10, %v5307_v1  ;;  %v1635_v1 = vsub.f32 %v4871_v18, %v1634_v54  ;;  %v5373_v18 = vld [vmem:[#allocation17_spill] sm:$0xff] }
 0x246   :  { %3515 = vmatpush1.bf16.msra.mxu1 %v4490_v42  ;;  %2184 = vmatprep.mubr.f32.mxu1 %v4934_v4 }
 0x247   :  { %3516 = vmatprep.subr.bf16.mxu1 %v5337_v50  ;;  %1601 = vmatprep.mubr.f32.mxu0 %v1600_v19  ;;  %v1621_v32 = vand.u32 4294901760, %v1620_v3  ;;  %v5352_v19 = vand.u32 4294901760, %v4796_v58  ;;  %v1649_v3 = vand.u32 4294901760, %v4885_v41  ;;  %v1636_v62 = vand.u32 4294901760, %v1635_v1 }
 0x248   :  { %v1658_v1 = vand.u32 4294901760, %v4894_v8 }
 0x249   :  { %2187 = vmatmul.mubr.f32.gmra.mrb[20].mxu1 %v4945_v37  ;;  %1607 = vmatmul.mubr.f32.gmra.mrb[28].mxu0 %v1606_v29  ;;  %v1643_v29 = vand.u32 4294901760, %v4877_v52 }
 0x24a   :  { %2193 = vmatprep.mubr.f32.mxu1 %v4954_v48  ;;  %1616 = vmatprep.mubr.f32.mxu0 %v1615_v24  ;;  %v5353_v24 = vand.u32 4294901760, %v4800_v25  ;;  %v1659_v59 = vsub.f32 %v4894_v8, %v1658_v1  ;;  %v5374_v8 = vld [vmem:[#allocation18_spill] sm:$0xff] }
 0x24b   :  { %v1644_v58 = vsub.f32 %v4877_v52, %v1643_v29  ;;  %v2839_v52 = vstv %s2838_s12 }
 0x24d   :  { %2196 = vmatmul.mubr.f32.gmra.mrb[22].mxu1 %v4965_v15  ;;  %1622 = vmatmul.mubr.f32.gmra.mrb[30].mxu0 %v1621_v32  ;;  %v1650_v32 = vsub.f32 %v4885_v41, %v1649_v3  ;;  %v1645_v25 = vand.u32 4294901760, %v1644_v58  ;;  %v1673_v58 = vand.u32 4294901760, %v4914_v47  ;;  %v2834_v41 = vstv %s2833_s13 }
 0x24e   :  { %2202 = vmatprep.mubr.f32.mxu1 %v4973_v51  ;;  %1631 = vmatprep.mubr.f32.mxu0 %v1630_v27 }
 0x24f   :  { %v1651_v27 = vand.u32 4294901760, %v1650_v32  ;;  %v1679_v32 = vand.u32 4294901760, %v4925_v28 }
 0x251   :  { %2205 = vmatmul.mubr.f32.gmra.mrb[24].mxu1 %v4983_v0  ;;  %1637 = vmatmul.mubr.f32.gmra.mrb[32].mxu0 %v1636_v62  ;;  %v1665_v62 = vsub.f32 %v4905_v20, %v1664_v14  ;;  %v2841_v20 = vsel %vm2840_vm2, %v2834_v41, %v2839_v52 }
 0x252   :  { %2297 = vmatprep.mubr.f32.mxu1 %v5352_v19  ;;  %v5354_v19 = vld [vmem:[#allocation8_spill] sm:$0xff]  ;;  %1646 = vmatprep.mubr.f32.mxu0 %v1645_v25 }
 0x253   :  { %v1666_v25 = vand.u32 4294901760, %v1665_v62  ;;  %v1694_v62 = vand.u32 4294901760, %v4945_v37 }
 0x255   :  { %2301 = vmatmul.mubr.f32.vlgmr.msra.gmra.mrb[0].mxu1 %v5353_v24  ;;  %v5356_v24 = vand.u32 4294901760, %v4811_v46  ;;  %1652 = vmatmul.mubr.f32.gmra.mrb[34].mxu0 %v1651_v27  ;;  %v1660_v46 = vand.u32 4294901760, %v1659_v59  ;;  %v1680_v27 = vsub.f32 %v4925_v28, %v1679_v32  ;;  %v1688_v59 = vand.u32 4294901760, %v4934_v4 }
 0x256   :  { %3518 = vmatpush1.bf16.msra.mxu1 %v5354_v19  ;;  %2308 = vmatprep.mubr.f32.mxu1 %v5355_v34  ;;  %v5357_v34 = vld [vmem:[#allocation9_spill] sm:$0xff]  ;;  %v5358_v19 = vand.u32 4294901760, %v4817_v16  ;;  %v1674_v16 = vsub.f32 %v4914_v47, %v1673_v58  ;;  %v2847_v47 = vstv %s2846_s15 }
 0x257   :  { %3519 = vmatprep.subr.bf16.mxu1 %v5337_v50  ;;  %1661 = vmatprep.mubr.f32.mxu0 %v1660_v46  ;;  %v1681_v46 = vand.u32 4294901760, %v1680_v27  ;;  %v5310_v27 = vand.u32 4294901760, %v4965_v15 }
 0x259   :  { %2312 = vmatmul.mubr.f32.gmra.mrb[2].mxu1 %v5356_v24  ;;  %v5359_v24 = vand.u32 4294901760, %v4823_v2  ;;  %1667 = vmatmul.mubr.f32.gmra.mrb[36].mxu0 %v1666_v25  ;;  %v1675_v2 = vand.u32 4294901760, %v1674_v16  ;;  %v1695_v25 = vsub.f32 %v4945_v37, %v1694_v62  ;;  %v1703_v16 = vand.u32 4294901760, %v4954_v48  ;;  %v5382_v37 = vld [vmem:[#allocation24_spill] sm:$0xff] }
 0x25a   :  { %3521 = vmatpush1.bf16.msra.mxu1 %v5357_v34  ;;  %2319 = vmatprep.mubr.f32.mxu1 %v5358_v19  ;;  %v5360_v34 = vld [vmem:[#allocation11_spill] sm:$0xff]  ;;  %v5361_v19 = vand.u32 4294901760, %v4829_v5  ;;  %v1689_v5 = vsub.f32 %v4934_v4, %v1688_v59  ;;  %v5375_v4 = vand.u32 4294901760, %v4965_v15 }
 0x25b   :  { %3522 = vmatprep.subr.bf16.mxu1 %v5337_v50  ;;  %1676 = vmatprep.mubr.f32.mxu0 %v1675_v2  ;;  %v1696_v2 = vand.u32 4294901760, %v1695_v25  ;;  %v1724_v25 = vand.u32 4294901760, %v4983_v0 }
 0x25d   :  { %2323 = vmatmul.mubr.f32.gmra.mrb[4].mxu1 %v5359_v24  ;;  %v5362_v24 = vand.u32 4294901760, %v4835_v23  ;;  %1682 = vmatmul.mubr.f32.gmra.mrb[38].mxu0 %v1681_v46  ;;  %v1690_v23 = vand.u32 4294901760, %v1689_v5  ;;  %v1710_v46 = vsub.f32 %v4965_v15, %v5310_v27  ;;  %v1718_v5 = vand.u32 4294901760, %v4973_v51  ;;  %v5384_v15 = vld [vmem:[#allocation28_spill] sm:$0xff] }
 0x25e   :  { %3524 = vmatpush1.bf16.msra.mxu1 %v5360_v34  ;;  %2330 = vmatprep.mubr.f32.mxu1 %v5361_v19  ;;  %v5363_v34 = vld [vmem:[#allocation12_spill] sm:$0xff]  ;;  %v5364_v19 = vand.u32 4294901760, %v4841_v22  ;;  %v1704_v22 = vsub.f32 %v4954_v48, %v1703_v16  ;;  %v1725_v27 = vsub.f32 %v4983_v0, %v1724_v25  ;;  %v3845_v0 = vmov 0   ;;  %v5385_v48 = vld [vmem:[#allocation29_spill] sm:$0xff] }
 0x25f   :  { %3525 = vmatprep.subr.bf16.mxu1 %v5337_v50  ;;  %1691 = vmatprep.mubr.f32.mxu0 %v1690_v23  ;;  %v1711_v23 = vand.u32 4294901760, %v1710_v46 }
 0x260   :  { %3797 = vset.pattern.permute.xlu0 %v3845_v0  ;;  %3798 = vset.pattern.permute.xlu1 %v3845_v0 }
 0x261   :  { %2334 = vmatmul.mubr.f32.gmra.mrb[6].mxu1 %v5362_v24  ;;  %v5365_v24 = vand.u32 4294901760, %v4847_v17  ;;  %1697 = vmatmul.mubr.f32.gmra.mrb[40].mxu0 %v1696_v2  ;;  %v1705_v17 = vand.u32 4294901760, %v1704_v22  ;;  %v1726_v22 = vand.u32 4294901760, %v1725_v27 }
 0x262   :  { %3527 = vmatpush1.bf16.msra.mxu1 %v5363_v34  ;;  %2341 = vmatprep.mubr.f32.mxu1 %v5364_v19  ;;  %v5366_v34 = vld [vmem:[#allocation13_spill] sm:$0xff]  ;;  %v5367_v19 = vand.u32 4294901760, %v4853_v38  ;;  %v1719_v38 = vsub.f32 %v4973_v51, %v1718_v5 }
 0x263   :  { %3528 = vmatprep.subr.bf16.mxu1 %v5337_v50  ;;  %1706 = vmatprep.mubr.f32.mxu0 %v1705_v17 }
 0x264   :  { %v1720_v2 = vand.u32 4294901760, %v1719_v38  ;;  %2903 = vperm.xlu0 %3797, %v2839_v52   ;;  %2924 = vperm.xlu1 %3798, %v2847_v47  }
 0x265   :  { %2345 = vmatmul.mubr.f32.gmra.mrb[8].mxu1 %v5365_v24  ;;  %v5368_v24 = vand.u32 4294901760, %v4859_v10  ;;  %1712 = vmatmul.mubr.f32.gmra.mrb[42].mxu0 %v1711_v23  ;;  %v5371_v10 = vld [vmem:[#allocation15_spill] sm:$0xff] }
 0x266   :  { %3530 = vmatpush1.bf16.msra.mxu1 %v5366_v34  ;;  %2352 = vmatprep.mubr.f32.mxu1 %v5367_v19  ;;  %v5369_v34 = vld [vmem:[#allocation14_spill] sm:$0xff]  ;;  %v5370_v19 = vand.u32 4294901760, %v4865_v55  ;;  %v5372_v55 = vld [vmem:[#allocation16_spill] sm:$0xff] }
 0x267   :  { %3531 = vmatprep.subr.bf16.mxu1 %v5337_v50  ;;  %1721 = vmatprep.mubr.f32.mxu0 %v1720_v2 }
 0x268   :  { %2898 = vperm.xlu0 %3797, %v2841_v20  }
 0x269   :  { %2356 = vmatmul.mubr.f32.gmra.mrb[10].mxu1 %v5368_v24  ;;  %1727 = vmatmul.mubr.f32.gmra.mrb[44].mxu0 %v1726_v22 }
 0x26a   :  { %3533 = vmatpush1.bf16.msra.mxu1 %v5369_v34  ;;  %2363 = vmatprep.mubr.f32.mxu1 %v5370_v19 }
 0x26b   :  { %3534 = vmatprep.subr.bf16.mxu1 %v5337_v50 }
 0x26c   :  { %2893 = vperm.xlu0 %3797, %v2834_v41  }
 0x26d   :  { %2367 = vmatmul.mubr.f32.gmra.mrb[12].mxu1 %v1634_v54  ;;  %v2844_v54 = vstv %s2843_s16 }
 0x26e   :  { %3536 = vmatpush1.bf16.msra.mxu1 %v5371_v10  ;;  %2374 = vmatprep.mubr.f32.mxu1 %v1643_v29  ;;  %v2848_v28 = vsel %vm2840_vm2, %v2844_v54, %v2847_v47 }
 0x26f   :  { %3537 = vmatprep.subr.bf16.mxu1 %v5337_v50  ;;  %2919 = vperm.xlu1 %3798, %v2848_v28  }
 0x271   :  { %2378 = vmatmul.mubr.f32.gmra.mrb[14].mxu1 %v1649_v3 }
 0x272   :  { %3539 = vmatpush1.bf16.msra.mxu1 %v5372_v55  ;;  %2385 = vmatprep.mubr.f32.mxu1 %v1658_v1 }
 0x273   :  { %3540 = vmatprep.subr.bf16.mxu1 %v5337_v50  ;;  %2914 = vperm.xlu1 %3798, %v2844_v54  }
 0x275   :  { %2389 = vmatmul.mubr.f32.gmra.mrb[16].mxu1 %v1664_v14 }
 0x276   :  { %3542 = vmatpush1.bf16.msra.mxu1 %v5373_v18  ;;  %2396 = vmatprep.mubr.f32.mxu1 %v1673_v58 }
 0x277   :  { %3543 = vmatprep.subr.bf16.mxu1 %v5337_v50 }
 0x279   :  { %2400 = vmatmul.mubr.f32.gmra.mrb[18].mxu1 %v1679_v32 }
 0x27a   :  { %3545 = vmatpush1.bf16.msra.mxu1 %v5374_v8  ;;  %2407 = vmatprep.mubr.f32.mxu1 %v1688_v59 }
 0x27b   :  { %3546 = vmatprep.subr.bf16.mxu1 %v5337_v50 }
 0x27d   :  { %2411 = vmatmul.mubr.f32.gmra.mrb[20].mxu1 %v1694_v62 }
 0x27e   :  { %2418 = vmatprep.mubr.f32.mxu1 %v1703_v16 }
 0x281   :  { %2422 = vmatmul.mubr.f32.gmra.mrb[22].mxu1 %v5375_v4 }
 0x282   :  { %2429 = vmatprep.mubr.f32.mxu1 %v1718_v5 }
 0x285   :  { %2433 = vmatmul.mubr.f32.gmra.mrb[24].mxu1 %v1724_v25 }
 0x286   :  { %2563 = vmatprep.mubr.f32.mxu1 %v4314_v21 }
 0x289   :  { %2565 = vmatmul.mubr.f32.vlgmr.msra.gmra.mrb[0].mxu1 %v4532_v12 }
 0x28a   :  { %3548 = vmatpush1.bf16.msra.mxu1 %v4319_v56  ;;  %2570 = vmatprep.mubr.f32.mxu1 %v4535_v9  ;;  %v5376_v56 = vld [vmem:[#allocation19_spill] sm:$0xff] }
 0x28b   :  { %3549 = vmatprep.subr.bf16.mxu1 %v5337_v50 }
 0x28d   :  { %2572 = vmatmul.mubr.f32.gmra.mrb[2].mxu1 %v4551_v60 }
 0x28e   :  { %3551 = vmatpush1.bf16.msra.mxu1 %v4332_v43  ;;  %2577 = vmatprep.mubr.f32.mxu1 %v4558_v40  ;;  %v5377_v43 = vld [vmem:[#allocation20_spill] sm:$0xff] }
 0x28f   :  { %3552 = vmatprep.subr.bf16.mxu1 %v5337_v50 }
 0x291   :  { %2579 = vmatmul.mubr.f32.gmra.mrb[4].mxu1 %v4574_v57 }
 0x292   :  { %3554 = vmatpush1.bf16.msra.mxu1 %v4349_v33  ;;  %2584 = vmatprep.mubr.f32.mxu1 %v4581_v13  ;;  %v5378_v33 = vld [vmem:[#allocation10_spill] sm:$0xff] }
 0x293   :  { %3555 = vmatprep.subr.bf16.mxu1 %v5337_v50 }
 0x295   :  { %2586 = vmatmul.mubr.f32.gmra.mrb[6].mxu1 %v4597_v45 }
 0x296   :  { %3557 = vmatpush1.bf16.msra.mxu1 %v4370_v49  ;;  %2591 = vmatprep.mubr.f32.mxu1 %v4604_v36  ;;  %v5379_v49 = vld [vmem:[#allocation21_spill] sm:$0xff] }
 0x297   :  { %3558 = vmatprep.subr.bf16.mxu1 %v5337_v50 }
 0x299   :  { %2593 = vmatmul.mubr.f32.gmra.mrb[8].mxu1 %v4620_v53 }
 0x29a   :  { %3560 = vmatpush1.bf16.msra.mxu1 %v4389_v39  ;;  %2598 = vmatprep.mubr.f32.mxu1 %v4627_v31  ;;  %v5380_v39 = vld [vmem:[#allocation22_spill] sm:$0xff] }
 0x29b   :  { %3561 = vmatprep.subr.bf16.mxu1 %v5337_v50 }
 0x29d   :  { %2600 = vmatmul.mubr.f32.gmra.mrb[10].mxu1 %v4643_v61 }
 0x29e   :  { %3563 = vmatpush1.bf16.msra.mxu1 %v4408_v7  ;;  %2605 = vmatprep.mubr.f32.mxu1 %v5376_v56  ;;  %v5381_v7 = vld [vmem:[#allocation23_spill] sm:$0xff] }
 0x29f   :  { %3564 = vmatprep.subr.bf16.mxu1 %v5337_v50 }
 0x2a1   :  { %2607 = vmatmul.mubr.f32.gmra.mrb[12].mxu1 %v5377_v43 }
 0x2a2   :  { %3566 = vmatpush1.bf16.msra.mxu1 %v5378_v33  ;;  %2612 = vmatprep.mubr.f32.mxu1 %v5379_v49 }
 0x2a3   :  { %3567 = vmatprep.subr.bf16.mxu1 %v5337_v50 }
 0x2a5   :  { %2614 = vmatmul.mubr.f32.gmra.mrb[14].mxu1 %v5380_v39 }
 0x2a6   :  { %3569 = vmatpush1.bf16.msra.mxu1 %v4448_v26  ;;  %2619 = vmatprep.mubr.f32.mxu1 %v4696_v11  ;;  %v5383_v26 = vld [vmem:[#allocation25_spill] sm:$0xff] }
 0x2a7   :  { %3570 = vmatprep.subr.bf16.mxu1 %v5337_v50 }
 0x2a9   :  { %2621 = vmatmul.mubr.f32.gmra.mrb[16].mxu1 %v5381_v7 }
 0x2aa   :  { %3572 = vmatpush1.bf16.msra.mxu1 %v4469_v35  ;;  %2626 = vmatprep.mubr.f32.mxu1 %v4719_v30 }
 0x2ab   :  { %3573 = vmatprep.subr.bf16.mxu1 %v5337_v50 }
 0x2ad   :  { %2628 = vmatmul.mubr.f32.gmra.mrb[18].mxu1 %v4735_v63 }
 0x2ae   :  { %3575 = vmatpush1.bf16.msra.mxu1 %v4490_v42  ;;  %2633 = vmatprep.mubr.f32.mxu1 %v4742_v6 }
 0x2b1   :  { %2635 = vmatmul.mubr.f32.gmra.mrb[20].mxu1 %v5382_v37 }
 0x2b2   :  { %2640 = vmatprep.mubr.f32.mxu1 %v5383_v26 }
 0x2b5   :  { %2642 = vmatmul.mubr.f32.gmra.mrb[22].mxu1 %v5384_v15 }
 0x2b6   :  { %2647 = vmatprep.mubr.f32.mxu1 %v5385_v48 }
 0x2b9   :  { %2649 = vmatmul.mubr.f32.gmra.mrb[24].mxu1 %v4791_v44 }
 0x2ba   :  { %2739 = vmatprep.mubr.f32.mxu1 %v4314_v21 }
 0x2bd   :  { %2741 = vmatmul.mubr.f32.vlgmr.msra.gmra.mrb[0].mxu1 %v4532_v12 }
 0x2be   :  { %2746 = vmatprep.mubr.f32.mxu1 %v4535_v9 }
 0x2c1   :  { %2748 = vmatmul.mubr.f32.gmra.mrb[2].mxu1 %v4551_v60 }
 0x2c2   :  { %2753 = vmatprep.mubr.f32.mxu1 %v4558_v40 }
 0x2c5   :  { %2755 = vmatmul.mubr.f32.gmra.mrb[4].mxu1 %v4574_v57 }
 0x2c6   :  { %2760 = vmatprep.mubr.f32.mxu1 %v4581_v13 }
 0x2c9   :  { %2762 = vmatmul.mubr.f32.gmra.mrb[6].mxu1 %v4597_v45 }
 0x2ca   :  { %2767 = vmatprep.mubr.f32.mxu1 %v4604_v36 }
 0x2cd   :  { %2769 = vmatmul.mubr.f32.gmra.mrb[8].mxu1 %v4620_v53 }
 0x2ce   :  { %2774 = vmatprep.mubr.f32.mxu1 %v4627_v31 }
 0x2d1   :  { %2776 = vmatmul.mubr.f32.gmra.mrb[10].mxu1 %v4643_v61 }
 0x2d2   :  { %2781 = vmatprep.mubr.f32.mxu1 %v5376_v56 }
 0x2d5   :  { %2783 = vmatmul.mubr.f32.gmra.mrb[12].mxu1 %v5377_v43 }
 0x2d6   :  { %2788 = vmatprep.mubr.f32.mxu1 %v5379_v49 }
 0x2d9   :  { %2790 = vmatmul.mubr.f32.gmra.mrb[14].mxu1 %v5380_v39 }
 0x2da   :  { %2795 = vmatprep.mubr.f32.mxu1 %v4696_v11 }
 0x2dd   :  { %2797 = vmatmul.mubr.f32.gmra.mrb[16].mxu1 %v5381_v7 }
 0x2de   :  { %2802 = vmatprep.mubr.f32.mxu1 %v4719_v30 }
 0x2e1   :  { %2804 = vmatmul.mubr.f32.gmra.mrb[18].mxu1 %v4735_v63 }
 0x2e2   :  { %2809 = vmatprep.mubr.f32.mxu1 %v4742_v6 }
 0x2e5   :  { %2811 = vmatmul.mubr.f32.gmra.mrb[20].mxu1 %v5382_v37 }
 0x2e6   :  { %2816 = vmatprep.mubr.f32.mxu1 %v5383_v26 }
 0x2e9   :  { %2818 = vmatmul.mubr.f32.gmra.mrb[22].mxu1 %v5384_v15 }
 0x2ea   :  { %2823 = vmatprep.mubr.f32.mxu1 %v5385_v48 }
 0x2ed   :  { %2825 = vmatmul.mubr.f32.gmra.mrb[24].mxu1 %v4791_v44 }
 0x2ee   :  { %v1548_v21 = vpop.f32.mrb[20].mxu0 }
 0x2ef   :  { %v1550_v11 = vpop.f32.mrb[21].mxu0 }
 0x310   :  { %v1563_v35 = vpop.f32.mrb[22].mxu0 }
 0x311   :  { %v1565_v42 = vpop.f32.mrb[23].mxu0 }
 0x314   :  { %v1578_v50 = vpop.f32.mrb[24].mxu0 }
 0x315   :  { %v1580_v30 = vpop.f32.mrb[25].mxu0 }
 0x318   :  { %v1593_v12 = vpop.f32.mrb[26].mxu0 }
 0x319   :  { %v1595_v9 = vpop.f32.mrb[27].mxu0 }
 0x31c   :  { %v1608_v60 = vpop.f32.mrb[28].mxu0 }
 0x31d   :  { %v1610_v6 = vpop.f32.mrb[29].mxu0 }
 0x320   :  { %v1623_v40 = vpop.f32.mrb[30].mxu0 }
 0x321   :  { %v1625_v57 = vpop.f32.mrb[31].mxu0 }
 0x324   :  { %v1638_v13 = vpop.f32.mrb[32].mxu0 }
 0x325   :  { %v1640_v45 = vpop.f32.mrb[33].mxu0 }
 0x328   :  { %v5194_v36 = vpop.f32.mrb[34].mxu0 }
 0x329   :  { %v1655_v53 = vpop.f32.mrb[35].mxu0 }
 0x32c   :  { %v5196_v31 = vpop.f32.mrb[36].mxu0 }
 0x32d   :  { %v1670_v61 = vpop.f32.mrb[37].mxu0 }
 0x330   :  { %v5198_v63 = vpop.f32.mrb[38].mxu0 }
 0x331   :  { %v1685_v44 = vpop.f32.mrb[39].mxu0 }
 0x332   :  { %v5223_v44 = vpop.permute.xlu1 %2924 }
 0x334   :  { %v5200_v51 = vpop.f32.mrb[40].mxu0 }
 0x335   :  { %v1700_v29 = vpop.f32.mrb[41].mxu0 }
 0x336   :  { %v5225_v29 = vpop.permute.xlu0 %2903 }
 0x338   :  { %v5202_v3 = vpop.f32.mrb[42].mxu0 }
 0x339   :  { %v1715_v1 = vpop.f32.mrb[43].mxu0 }
 0x33c   :  { %v5204_v14 = vpop.f32.mrb[44].mxu0 }
 0x33d   :  { %v1730_v58 = vpop.f32.mrb[45].mxu0 }
 0x390   :  { %v2742_v32 = vpop.f32.mrb[0].mxu1 }
 0x391   :  { %v3576_v59 = vadd.f32 %v2742_v32, %v1548_v21  ;;  %v2744_v62 = vpop.f32.mrb[1].mxu1 }
 0x393   :  { %v2885_v10 = vmul.f32 2.0, %v3576_v59  ;;  %v2849_v8 = vmul.f32 %v3576_v59, %v3576_v59 }
 0x394   :  { %v2749_v16 = vpop.f32.mrb[2].mxu1 }
 0x395   :  { %v3577_v27 = vadd.f32 %v2749_v16, %v1563_v35  ;;  %v2751_v46 = vpop.f32.mrb[3].mxu1 }
 0x397   :  { %v2886_v33 = vmul.f32 2.0, %v3577_v27  ;;  %v2850_v21 = vmul.f32 %v3577_v27, %v3577_v27 }
 0x398   :  { %v2756_v5 = vpop.f32.mrb[4].mxu1 }
 0x399   :  { %v3578_v17 = vadd.f32 %v2756_v5, %v1578_v50  ;;  %v2758_v25 = vpop.f32.mrb[5].mxu1 }
 0x39b   :  { %v2851_v24 = vmul.f32 %v3578_v17, %v3578_v17  ;;  %v2868_v19 = vrot.slane %v3578_v17, 4  ;;  %v2887_v28 = vmul.f32 2.0, %v3578_v17 }
 0x39c   :  { %v2763_v23 = vpop.f32.mrb[6].mxu1 }
 0x39d   :  { %v3579_v38 = vadd.f32 %v2763_v23, %v1593_v12  ;;  %v2765_v34 = vpop.f32.mrb[7].mxu1  ;;  %v2933_v20 = vrot.slane %v2851_v24, 4 }
 0x39f   :  { %v2858_v2 = vmul.f32 %v3579_v38, %v3579_v38  ;;  %v2869_v22 = vrot.slane %v3579_v38, 4 }
 0x3a0   :  { %v2770_v0 = vpop.f32.mrb[8].mxu1 }
 0x3a1   :  { %v2934_v55 = vrot.slane %v2858_v2, 4  ;;  %v3580_v18 = vadd.f32 %v2770_v0, %v1608_v60  ;;  %v2772_v52 = vpop.f32.mrb[9].mxu1  ;;  %v2870_v41 = vsel %vm2867_vm3, %v2868_v19, %v2869_v22 }
 0x3a2   :  { %v5207_v47 = vmul.f32 %v2885_v10, %v2870_v41  ;;  %v5209_v54 = vmul.f32 %v3576_v59, %v2870_v41 }
 0x3a3   :  { %v2859_v4 = vmul.f32 %v3580_v18, %v3580_v18  ;;  %v2871_v56 = vrot.slane %v3580_v18, 4  ;;  %v2935_v43 = vsel %vm2867_vm3, %v2933_v20, %v2934_v55 }
 0x3a4   :  { %v2941_v49 = vadd.f32 %v2935_v43, %v2849_v8  ;;  %v2777_v39 = vpop.f32.mrb[10].mxu1 }
 0x3a5   :  { %v5212_v7 = vmul.f32 %v2887_v28, %v2871_v56  ;;  %v2936_v37 = vrot.slane %v2859_v4, 4  ;;  %v3581_v26 = vadd.f32 %v2777_v39, %v1623_v40  ;;  %v2779_v15 = vpop.f32.mrb[11].mxu1  ;;  %v2872_v48 = vsel %vm2867_vm3, %v2869_v22, %v2871_v56 }
 0x3a6   :  { %v5215_v11 = vmul.f32 %v3577_v27, %v2872_v48  ;;  %v5217_v35 = vmul.f32 %v2886_v33, %v2872_v48  ;;  %v5219_v42 = vmul.f32 %v3578_v17, %v2871_v56  ;;  %v2920_v27 = vpop.permute.xlu1 %2919 }
 0x3a7   :  { %v2943_v50 = vadd.f32 %v2936_v37, %v2851_v24  ;;  %v2852_v30 = vsub.f32 %v3581_v26, %v2849_v8  ;;  %v2937_v12 = vsel %vm2867_vm3, %v2934_v55, %v2936_v37 }
 0x3a8   :  { %v2784_v9 = vpop.f32.mrb[12].mxu1  ;;  %v2942_v60 = vadd.f32 %v2937_v12, %v2850_v21 }
 0x3a9   :  { %v3582_v6 = vadd.f32 %v2784_v9, %v1638_v13  ;;  %v2786_v57 = vpop.f32.mrb[13].mxu1  ;;  %v2899_v13 = vpop.permute.xlu0 %2898  ;;  %v2855_v34 = vmul.f32 1.0208334, %v2852_v30  ;;  %v2946_v37 = vadd.f32 %v2943_v50, %v5225_v29 }
 0x3aa   :  { %v2945_v48 = vadd.f32 %v2942_v60, %v2899_v13 }
 0x3ab   :  { %v2853_v45 = vsub.f32 %v3582_v6, %v2850_v21 }
 0x3ac   :  { %v2791_v40 = vpop.f32.mrb[14].mxu1 }
 0x3ad   :  { %v3583_v53 = vadd.f32 %v2791_v40, %v5194_v36  ;;  %v2793_v61 = vpop.f32.mrb[15].mxu1  ;;  %v2894_v55 = vpop.permute.xlu0 %2893 }
 0x3ae   :  { %v2944_v41 = vadd.f32 %v2941_v49, %v2894_v55  ;;  %v2906_v49 = vadd.f32 %v2894_v55, %v5207_v47  ;;  %v2907_v47 = vadd.f32 %v2899_v13, %v5217_v35 }
 0x3af   :  { %v2854_v1 = vsub.f32 %v3583_v53, %v2851_v24 }
 0x3b0   :  { %v2798_v58 = vpop.f32.mrb[16].mxu1 }
 0x3b1   :  { %v3584_v32 = vadd.f32 %v2798_v58, %v5196_v31  ;;  %v2800_v59 = vpop.f32.mrb[17].mxu1  ;;  %v2857_v62 = vmul.f32 1.0208334, %v2854_v1  ;;  %v2915_v31 = vpop.permute.xlu1 %2914 }
 0x3b3   :  { %v2860_v16 = vsub.f32 %v3584_v32, %v2858_v2  ;;  %v2950_v36 = vrot.slane %v2857_v62, 4  ;;  %v2908_v32 = vadd.f32 %v5225_v29, %v5212_v7 }
 0x3b4   :  { %v2805_v46 = vpop.f32.mrb[18].mxu1 }
 0x3b5   :  { %v2862_v5 = vmul.f32 1.0208334, %v2860_v16  ;;  %v3585_v17 = vadd.f32 %v2805_v46, %v5198_v63  ;;  %v2807_v25 = vpop.f32.mrb[19].mxu1  ;;  %v2856_v63 = vmul.f32 1.0208334, %v2853_v45 }
 0x3b7   :  { %v2951_v23 = vrot.slane %v2862_v5, 4  ;;  %v2861_v38 = vsub.f32 %v3585_v17, %v2859_v4 }
 0x3b8   :  { %v2812_v19 = vpop.f32.mrb[20].mxu1 }
 0x3b9   :  { %v2863_v22 = vmul.f32 1.0208334, %v2861_v38  ;;  %v3586_v24 = vadd.f32 %v2812_v19, %v5200_v51  ;;  %v2814_v10 = vpop.f32.mrb[21].mxu1  ;;  %v2952_v0 = vsel %vm2867_vm3, %v2950_v36, %v2951_v23 }
 0x3ba   :  { %v2958_v2 = vadd.f32 %v2952_v0, %v2855_v34 }
 0x3bb   :  { %v2953_v18 = vrot.slane %v2863_v22, 4  ;;  %v2879_v52 = vsub.f32 %v3586_v24, %v5209_v54 }
 0x3bc   :  { %v2961_v20 = vadd.f32 %v2958_v2, %v2915_v31  ;;  %v2819_v8 = vpop.f32.mrb[22].mxu1 }
 0x3bd   :  { %v2960_v28 = vadd.f32 %v2953_v18, %v2857_v62  ;;  %v2954_v4 = vsel %vm2867_vm3, %v2951_v23, %v2953_v18  ;;  %v2882_v56 = vmul.f32 1.0208334, %v2879_v52  ;;  %v3587_v43 = vadd.f32 %v2819_v8, %v5202_v3  ;;  %v2821_v51 = vpop.f32.mrb[23].mxu1 }
 0x3be   :  { %v2959_v33 = vadd.f32 %v2954_v4, %v2856_v63  ;;  %v2967_v39 = vmul.f32 %v2961_v20, %v2944_v41 }
 0x3bf   :  { %v2963_v26 = vadd.f32 %v2960_v28, %v5223_v44  ;;  %v2909_v15 = vmul.f32 2.0, %v2882_v56  ;;  %v2880_v54 = vsub.f32 %v3587_v43, %v5215_v11 }
 0x3c0   :  { %v2962_v21 = vadd.f32 %v2959_v33, %v2920_v27  ;;  %3799 = vrcp.f32 %v2967_v39  ;;  %v2826_v30 = vpop.f32.mrb[24].mxu1 }
 0x3c1   :  { %v2969_v12 = vmul.f32 %v2963_v26, %v2946_v37  ;;  %v2927_v9 = vadd.f32 %v2915_v31, %v2909_v15  ;;  %v2883_v6 = vmul.f32 1.0208334, %v2880_v54  ;;  %v3588_v3 = vadd.f32 %v2826_v30, %v5204_v14  ;;  %v2828_v57 = vpop.f32.mrb[25].mxu1 }
 0x3c2   :  { %v2968_v45 = vmul.f32 %v2962_v21, %v2945_v48 }
 0x3c3   :  { %3801 = vrcp.f32 %v2969_v12  ;;  %v2964_v50 = vmul.f32 %v2927_v9, %v2906_v49  ;;  %v2910_v40 = vmul.f32 2.0, %v2883_v6  ;;  %v2881_v53 = vsub.f32 %v3588_v3, %v5219_v42 }
 0x3c4   :  { %3803 = vrcp.f32 %v2968_v45 }
 0x3c5   :  { %v2928_v11 = vadd.f32 %v2920_v27, %v2910_v40  ;;  %v2884_v61 = vmul.f32 1.0208334, %v2881_v53 }
 0x3c7   :  { %v2911_v60 = vmul.f32 2.0, %v2884_v61  ;;  %v2965_v1 = vmul.f32 %v2928_v11, %v2907_v47 }
 0x3c9   :  { %v2929_v58 = vadd.f32 %v5223_v44, %v2911_v60 }
 0x3ca   :  { %v3800_v14 = vpop.eup %3799 }
 0x3cb   :  { %v2966_v59 = vmul.f32 %v2929_v58, %v2908_v32  ;;  %v2971_v62 = vmul.f32 %v3800_v14, %v2964_v50 }
 0x3cd   :  { %v3802_v16 = vpop.eup %3801  ;;  %v2977_v35 = vsel %vm2976_vm5, %v2971_v62, 0.0 }
 0x3ce   :  { %v3804_v46 = vpop.eup %3803  ;;  %v2975_v5 = vmul.f32 %v3802_v16, %v2966_v59 }
 0x3cf   :  { %v2973_v42 = vmul.f32 %v3804_v46, %v2965_v1 }
 0x3d0   :  { %v2984_v17 = vsel %vm2983_vm4, %v2975_v5, 0.0 }
 0x3d1   :  { %2985 = vadd.xlane.f32.xlu1 %v2984_v17  ;;  %v2980_v27 = vsel %vm2976_vm5, %v2973_v42, 0.0 }
 0x3d2   :  { %2981 = vadd.xlane.f32.xlu0 %v2980_v27 }
 0x3d6   :  { %2978 = vadd.xlane.f32.xlu0 %v2977_v35 }
 0x45e   :  { %v2986_v13 = vpop.xlane.xlu1 %2985 }
 0x45f   :  { %v3000_v44 = vrot.slane %v2986_v13, 2  ;;  %v2982_v25 = vpop.xlane.xlu0 %2981 }
 0x460   :  { %v2999_v7 = vrot.slane %v2982_v25, 2  ;;  %v2987_v38 = vsel %vm2840_vm2, %v2982_v25, 0.0 }
 0x461   :  { %v3004_v29 = vsel %vm2840_vm2, %v3000_v44, 0.0 }
 0x462   :  { %v3001_v36 = vsel %vm2998_vm6, %v2999_v7, %v3000_v44 }
 0x463   :  { %v3005_v23 = vadd.f32 %v3004_v29, %v3001_v36  ;;  %v2979_v34 = vpop.xlane.xlu0 %2978 }
 0x464   :  { %v2988_v19 = vadd.f32 %v2987_v38, %v2979_v34 }
 0x465   :  { %v3006_v22 = vrot.slane %v3005_v23, 4 }
 0x466   :  { %v2989_v24 = vrot.slane %v2988_v19, 4 }
 0x467   :  { %v3007_v10 = vadd.f32 %v3006_v22, %v3005_v23 }
 0x468   :  { %v2990_v31 = vadd.f32 %v2989_v24, %v2988_v19 }
 0x469   :  { %v3008_v0 = vrot.slane %v3007_v10, 2 }
 0x46a   :  { %v2991_v2 = vrot.slane %v2990_v31, 2 }
 0x46b   :  { %v3009_v55 = vadd.f32 %v3008_v0, %v3007_v10 }
 0x46c   :  { %v2992_v18 = vadd.f32 %v2991_v2, %v2990_v31 }
 0x46d   :  { %v3010_v52 = vrot.slane %v3009_v55, 1 }
 0x46e   :  { %v2993_v41 = vrot.slane %v2992_v18, 1 }
 0x46f   :  { %v3011_v63 = vadd.f32 %v3010_v52, %v3009_v55 }
 0x470   :  { %v2994_v20 = vadd.f32 %v2993_v41, %v2992_v18 }
 0x471   :  { %v3012_v8 = vmul.f32 0.01, %v3011_v63 }
 0x472   :  { %v2995_v28 = vmul.f32 0.01, %v2994_v20 }
 0x474   :  { %v3014_v4 = vsel %vm3013_vm7, %v2995_v28, %v3012_v8 }
 0x475   :  { %3016 = vst.msk [vmem:[#allocation4] sm:$0x1] %vm3015_vm8, %v3014_v4 }
 0x476   :  { %3828 = shalt.err (!%p3825_p9)
}
 0x477   :  { %s3829_s23 = scalar_lea.hbm %s5263_s5, 16 }
 0x478   :  { %p3830_p10 = scmp.ne.s32.totalorder %s5263_s5, %s3829_s23  ;;  %p3833_p11 = scmp.lt.u32.totalorder %s3829_s23, %s5263_s5 }
 0x47a   :  { %p3835_p12 = pnand %p3833_p11, %p3830_p10 }
 0x47c   :  { %3838 = shalt.err (!%p3835_p12)
}
 0x47d   :  { %3026 = dma.vmem_to_hbm [thread:$0]  %s3024_s18, 16, %s5263_s5, [#allocation5]  }
 0x47e   :  { %3841 = dma.done.wait [#allocation5], 16  }
 0x47f   :  { %3842 = vsyncadd [#allocation5], 4294967280 }
 0x480   :  { %3030 = vsyncpa [#allocation5], 1 }

</bundles_post_ra>
